<compile_context>
chip_gen: v7x
topology: tpu7x:2x2x1
jax: 0.10.0
libtpu: 0.0.40
codegen_flags: <defaults>
</compile_context>

<pallas_src>
import functools

import jax
import jax.numpy as jnp
from jax.experimental import pallas as pl
from jax.experimental.pallas import tpu as pltpu


def _default_vmem_limit():
    """Generation-aware VMEM budget (~0.6x physical): ~40 MiB on v7x (64 MiB
    physical), ~80 MiB on v5e/v6e (128 MiB).  Conservative fallback: 40 MiB."""
    try:
        cap = getattr(pltpu.get_tpu_info(), "vmem_capacity_bytes", None)
        if cap:
            return int(cap) * 5 // 8
    except Exception:
        pass
    return 40 * 1024 * 1024


_VMEM_LIMIT = _default_vmem_limit()


def _pick_tile(dim, prefs):
    """Largest preferred tile that evenly divides dim, else the full dim."""
    for t in prefs:
        if t <= dim and dim % t == 0:
            return t
    return dim


# ----------------------------- dense (matmul) kernels ------------------------------

def _dense_kernel(x_ref, w_ref, b_ref, o_ref, acc_ref, *, activation):
    k = pl.program_id(2)

    @pl.when(k == 0)
    def _init():
        acc_ref[...] = jnp.zeros_like(acc_ref)

    acc_ref[...] += jnp.dot(x_ref[...], w_ref[...],
                            preferred_element_type=jnp.float32)

    @pl.when(k == pl.num_programs(2) - 1)
    def _finalize():
        y = acc_ref[...] + b_ref[...]
        if activation == "gelu":
            # TODO(synk): tanh-approx GELU ("gelu_new"); exact erf GELU differs slightly.
            c = jnp.float32(0.7978845608028654)  # sqrt(2/pi)
            y = 0.5 * y * (1.0 + jnp.tanh(c * (y + 0.044715 * y * y * y)))
        o_ref[...] = y.astype(o_ref.dtype)


def dense(x, w, b, activation=None, out_dtype=jnp.bfloat16):
    """y = x @ w + b (optionally GELU). x:(M,K) bf16, w:(K,N) bf16, b:(N,) f32."""
    M, K = x.shape
    N = w.shape[1]
    tm = _pick_tile(M, (2048, 1024, 512, 256, 128))
    tn = _pick_tile(N, (512, 256, 128))
    tk = _pick_tile(K, (512, 256, 128))
    return pl.pallas_call(
        functools.partial(_dense_kernel, activation=activation),
        out_shape=jax.ShapeDtypeStruct((M, N), out_dtype),
        grid=(M // tm, N // tn, K // tk),
        in_specs=[pl.BlockSpec((tm, tk), lambda i, j, k: (i, k)),
                  pl.BlockSpec((tk, tn), lambda i, j, k: (k, j)),
                  pl.BlockSpec((1, tn), lambda i, j, k: (0, j))],
        out_specs=pl.BlockSpec((tm, tn), lambda i, j, k: (i, j)),
        scratch_shapes=[pltpu.VMEM((tm, tn), jnp.float32)],
        compiler_params=pltpu.CompilerParams(
            dimension_semantics=("parallel", "parallel", "arbitrary"),
            vmem_limit_bytes=_VMEM_LIMIT),
    )(x, w, b.astype(jnp.float32).reshape(1, N))


def _dense_res_ln_kernel(x_ref, w_ref, b_ref, r_ref, g_ref, bb_ref, o_ref, acc_ref,
                         *, eps):
    k = pl.program_id(1)

    @pl.when(k == 0)
    def _init():
        acc_ref[...] = jnp.zeros_like(acc_ref)

    acc_ref[...] += jnp.dot(x_ref[...], w_ref[...],
                            preferred_element_type=jnp.float32)

    @pl.when(k == pl.num_programs(1) - 1)
    def _finalize():
        y = acc_ref[...] + b_ref[...] + r_ref[...].astype(jnp.float32)
        mu = jnp.mean(y, axis=-1, keepdims=True)
        yc = y - mu
        var = jnp.mean(yc * yc, axis=-1, keepdims=True)
        y = yc * jax.lax.rsqrt(var + eps) * g_ref[...] + bb_ref[...]
        o_ref[...] = y.astype(o_ref.dtype)


def dense_residual_layernorm(x, w, b, residual, gamma, beta, eps=1e-12,
                             out_dtype=jnp.bfloat16):
    """layernorm(x @ w + b + residual). N (=hidden) kept whole so the LN reduction
    stays inside one block; M and K are tiled."""
    M, K = x.shape
    N = w.shape[1]
    tm = _pick_tile(M, (1024, 512, 256, 128))
    tk = _pick_tile(K, (512, 256, 128))
    return pl.pallas_call(
        functools.partial(_dense_res_ln_kernel, eps=eps),
        out_shape=jax.ShapeDtypeStruct((M, N), out_dtype),
        grid=(M // tm, K // tk),
        in_specs=[pl.BlockSpec((tm, tk), lambda i, k: (i, k)),
                  pl.BlockSpec((tk, N), lambda i, k: (k, 0)),
                  pl.BlockSpec((1, N), lambda i, k: (0, 0)),
                  pl.BlockSpec((tm, N), lambda i, k: (i, 0)),
                  pl.BlockSpec((1, N), lambda i, k: (0, 0)),
                  pl.BlockSpec((1, N), lambda i, k: (0, 0))],
        out_specs=pl.BlockSpec((tm, N), lambda i, k: (i, 0)),
        scratch_shapes=[pltpu.VMEM((tm, N), jnp.float32)],
        compiler_params=pltpu.CompilerParams(
            dimension_semantics=("parallel", "arbitrary"),
            vmem_limit_bytes=_VMEM_LIMIT),
    )(x, w, b.astype(jnp.float32).reshape(1, N), residual,
      gamma.astype(jnp.float32).reshape(1, N),
      beta.astype(jnp.float32).reshape(1, N))


# ----------------------------------- layernorm -----------------------------------

def _layernorm_kernel(x_ref, g_ref, b_ref, o_ref, *, eps):
    x = x_ref[...].astype(jnp.float32)
    mu = jnp.mean(x, axis=-1, keepdims=True)
    xc = x - mu
    var = jnp.mean(xc * xc, axis=-1, keepdims=True)
    o_ref[...] = (xc * jax.lax.rsqrt(var + eps) * g_ref[...]
                  + b_ref[...]).astype(o_ref.dtype)


def layernorm(x, gamma, beta, eps=1e-12, out_dtype=jnp.bfloat16):
    """Row-tiled layernorm over the last dim. x:(M,H)."""
    M, H = x.shape
    tm = _pick_tile(M, (1024, 512, 256, 128))
    return pl.pallas_call(
        functools.partial(_layernorm_kernel, eps=eps),
        out_shape=jax.ShapeDtypeStruct((M, H), out_dtype),
        grid=(M // tm,),
        in_specs=[pl.BlockSpec((tm, H), lambda i: (i, 0)),
                  pl.BlockSpec((1, H), lambda i: (0, 0)),
                  pl.BlockSpec((1, H), lambda i: (0, 0))],
        out_specs=pl.BlockSpec((tm, H), lambda i: (i, 0)),
        compiler_params=pltpu.CompilerParams(
            dimension_semantics=("parallel",),
            vmem_limit_bytes=_VMEM_LIMIT),
    )(x, gamma.astype(jnp.float32).reshape(1, H),
      beta.astype(jnp.float32).reshape(1, H))


# ------------------------ flash-style self-attention kernel ------------------------

def _flash_attn_kernel(q_ref, k_ref, v_ref, mask_ref, o_ref,
                       m_sc, l_sc, acc_sc, *, scale):
    kv = pl.program_id(2)

    @pl.when(kv == 0)
    def _init():
        m_sc[...] = jnp.full_like(m_sc, -jnp.inf)
        l_sc[...] = jnp.zeros_like(l_sc)
        acc_sc[...] = jnp.zeros_like(acc_sc)

    q = q_ref[0, 0]                       # (S, Dh)   bf16
    k = k_ref[0, 0]                       # (tkv, Dh) bf16
    v = v_ref[0, 0]                       # (tkv, Dh) bf16
    bias = mask_ref[0]                    # (1, tkv)  f32 additive mask

    s = jax.lax.dot_general(q, k, (((1,), (1,)), ((), ())),
                            preferred_element_type=jnp.float32) * scale + bias
    m_new = jnp.maximum(m_sc[...], jnp.max(s, axis=-1, keepdims=True))
    alpha = jnp.exp(m_sc[...] - m_new)
    p = jnp.exp(s - m_new)
    l_sc[...] = alpha * l_sc[...] + jnp.sum(p, axis=-1, keepdims=True)
    acc_sc[...] = alpha * acc_sc[...] + jnp.dot(
        p.astype(v.dtype), v, preferred_element_type=jnp.float32)
    m_sc[...] = m_new

    @pl.when(kv == pl.num_programs(2) - 1)
    def _finalize():
        o_ref[0, 0] = (acc_sc[...] / l_sc[...]).astype(o_ref.dtype)


def attention_core(qkv, add_mask, num_heads, head_dim):
    """qkv: (B, S, 3H) bf16 (q|k|v concatenated), add_mask: (B, 1, S) additive f32.
    Returns the attention context as a (B*S, H) bf16 matrix."""
    B, S, _ = qkv.shape
    H = num_heads * head_dim
    scale = 1.0 / float(head_dim) ** 0.5

    # One XLA relayout into per-head, lane-dense (B, nH, S, Dh) arrays; inside the
    # kernel every load/store then starts at lane 0 of its own array.
    qkv_h = jnp.transpose(qkv.reshape(B, S, 3, num_heads, head_dim), (2, 0, 3, 1, 4))
    q, k, v = qkv_h[0], qkv_h[1], qkv_h[2]

    tkv = _pick_tile(S, (512, 256, 128))
    n_kv = S // tkv

    ctx = pl.pallas_call(
        functools.partial(_flash_attn_kernel, scale=scale),
        out_shape=jax.ShapeDtypeStruct((B, num_heads, S, head_dim), jnp.bfloat16),
        grid=(B, num_heads, n_kv),
        in_specs=[pl.BlockSpec((1, 1, S, head_dim), lambda b, h, kv: (b, h, 0, 0)),
                  pl.BlockSpec((1, 1, tkv, head_dim), lambda b, h, kv: (b, h, kv, 0)),
                  pl.BlockSpec((1, 1, tkv, head_dim), lambda b, h, kv: (b, h, kv, 0)),
                  pl.BlockSpec((1, 1, tkv), lambda b, h, kv: (b, 0, kv))],
        out_specs=pl.BlockSpec((1, 1, S, head_dim), lambda b, h, kv: (b, h, 0, 0)),
        scratch_shapes=[pltpu.VMEM((S, 1), jnp.float32),
                        pltpu.VMEM((S, 1), jnp.float32),
                        pltpu.VMEM((S, head_dim), jnp.float32)],
        compiler_params=pltpu.CompilerParams(
            dimension_semantics=("parallel", "parallel", "arbitrary"),
            vmem_limit_bytes=_VMEM_LIMIT),
    )(q, k, v, add_mask)

    return jnp.transpose(ctx, (0, 2, 1, 3)).reshape(B * S, H)


# --------------------------- CLS normalize / score (XLA) ---------------------------

def score_and_normalize(q_cls, d_cls):
    """torch F.normalize(p=2, dim=1) + dot + clamp; tiny, left to XLA fusion."""
    q = q_cls.astype(jnp.float32)
    d = d_cls.astype(jnp.float32)
    qn = q / jnp.maximum(jnp.sqrt(jnp.sum(q * q, axis=-1, keepdims=True)), 1e-12)
    dn = d / jnp.maximum(jnp.sqrt(jnp.sum(d * d, axis=-1, keepdims=True)), 1e-12)
    score = jnp.clip(jnp.sum(qn * dn, axis=-1), 0.0, 1.0)
    return score, qn, dn


# ------------------------------ mini-BERT tower ------------------------------

def bert_encoder_cls(params, input_ids, attention_mask, token_type_ids, cfg):
    B, S = input_ids.shape
    H = cfg["hidden"]
    nH = cfg["heads"]
    Dh = H // nH
    M = B * S

    # Embeddings (gather = plain-JAX glue) -> bf16 -> Pallas layernorm.
    pos_ids = jnp.arange(S)
    emb = (params["word_emb"][input_ids]
           + params["pos_emb"][pos_ids][None, :, :]
           + params["type_emb"][token_type_ids])
    x = layernorm(emb.reshape(M, H).astype(jnp.bfloat16),
                  params["emb_ln_g"], params["emb_ln_b"])

    # BERT-style additive attention mask: 0 where attended, -10000 where masked.
    add_mask = ((1.0 - attention_mask.astype(jnp.float32)) * -10000.0).reshape(B, 1, S)

    for lp in params["layers"]:
        # --- self attention: fused QKV, flash-style per-head attention, fused O+res+LN
        qkv = dense(x, lp["wqkv"], lp["bqkv"])                               # (M, 3H)
        ctx = attention_core(qkv.reshape(B, S, 3 * H), add_mask, nH, Dh)     # (M, H)
        x = dense_residual_layernorm(ctx, lp["wo"], lp["bo"], x,
                                     lp["ln1_g"], lp["ln1_b"])
        # --- feed-forward: fused up-proj+GELU, fused down-proj+res+LN ---
        inter = dense(x, lp["wi"], lp["bi"], activation="gelu")
        x = dense_residual_layernorm(inter, lp["wf"], lp["bf"], x,
                                     lp["ln2_g"], lp["ln2_b"])

    return x.reshape(B, S, H)[:, 0, :]  # [CLS] token, bf16 (B, H)


def two_tower_bert(params, q_input_ids, d_input_ids,
                   q_input_mask, q_segment_ids, d_input_mask, d_segment_ids, cfg):
    query_cls = bert_encoder_cls(params["query"], q_input_ids, q_input_mask,
                                 q_segment_ids, cfg)
    document_cls = bert_encoder_cls(params["document"], d_input_ids, d_input_mask,
                                    d_segment_ids, cfg)
    score, query_n, document_n = score_and_normalize(query_cls, document_cls)
    return score, query_n, document_n


# ------------------------------ parameter init ------------------------------

def init_bert_params(key, cfg):
    H, I = cfg["hidden"], cfg["intermediate"]
    V, P, T, L = cfg["vocab"], cfg["max_pos"], cfg["type_vocab"], cfg["layers"]
    keys = jax.random.split(key, 3 + L)

    def w(k, shape, dtype=jnp.bfloat16):
        return (jax.random.normal(k, shape, jnp.float32) * 0.02).astype(dtype)

    params = {
        "word_emb": w(keys[0], (V, H), jnp.float32),
        "pos_emb": w(keys[1], (P, H), jnp.float32),
        "type_emb": w(keys[2], (T, H), jnp.float32),
        "emb_ln_g": jnp.ones((H,), jnp.float32),
        "emb_ln_b": jnp.zeros((H,), jnp.float32),
        "layers": [],
    }
    for l in range(L):
        lk = jax.random.split(keys[3 + l], 6)
        wq, wk, wv = w(lk[0], (H, H)), w(lk[1], (H, H)), w(lk[2], (H, H))
        params["layers"].append({
            "wqkv": jnp.concatenate([wq, wk, wv], axis=1),   # (H, 3H) bf16, fused QKV
            "bqkv": jnp.zeros((3 * H,), jnp.float32),
            "wo": w(lk[3], (H, H)), "bo": jnp.zeros((H,), jnp.float32),
            "ln1_g": jnp.ones((H,), jnp.float32), "ln1_b": jnp.zeros((H,), jnp.float32),
            "wi": w(lk[4], (H, I)), "bi": jnp.zeros((I,), jnp.float32),
            "wf": w(lk[5], (I, H)), "bf": jnp.zeros((H,), jnp.float32),
            "ln2_g": jnp.ones((H,), jnp.float32), "ln2_b": jnp.zeros((H,), jnp.float32),
        })
    return params


# ----------------------------------- main -----------------------------------

if __name__ == "__main__":
    cfg = dict(vocab=64, max_pos=16, type_vocab=2,
               hidden=32, heads=2, layers=2, intermediate=64)
    B, S = 2, 8

    key = jax.random.PRNGKey(0)
    kq, kd, ki1, ki2 = jax.random.split(key, 4)
    params = {"query": init_bert_params(kq, cfg),
              "document": init_bert_params(kd, cfg)}

    q_input_ids = jax.random.randint(ki1, (B, S), 0, cfg["vocab"], jnp.int32)
    d_input_ids = jax.random.randint(ki2, (B, S), 0, cfg["vocab"], jnp.int32)
    q_input_mask = jnp.ones((B, S), jnp.int32)
    q_segment_ids = jnp.zeros((B, S), jnp.int32)
    d_input_mask = jnp.ones((B, S), jnp.int32)
    d_segment_ids = jnp.zeros((B, S), jnp.int32)

    fwd = jax.jit(functools.partial(two_tower_bert, cfg=cfg))
    score, query, document = fwd(params, q_input_ids, d_input_ids,
                                 q_input_mask, q_segment_ids,
                                 d_input_mask, d_segment_ids)
    jax.block_until_ready((score, query, document))

    assert score.shape == (B,)
    assert query.shape == (B, cfg["hidden"])
    assert document.shape == (B, cfg["hidden"])
    print("KERNEL_OK")
</pallas_src>

<mosaic_0001>
module attributes {stable_mosaic.version = 11 : i64} {
  func.func @_dense_kernel(%arg0: i32, %arg1: i32, %arg2: i32, %arg3: memref<16x32xbf16, #tpu.memory_space<vmem>>, %arg4: memref<32x96xbf16, #tpu.memory_space<vmem>>, %arg5: memref<1x96xf32, #tpu.memory_space<vmem>>, %arg6: memref<16x96xbf16, #tpu.memory_space<vmem>>, %arg7: memref<16x96xf32, #tpu.memory_space<vmem>>) attributes {dimension_semantics = [#tpu.dimension_semantics<parallel>, #tpu.dimension_semantics<parallel>, #tpu.dimension_semantics<arbitrary>], iteration_bounds = array<i64: 1, 1, 1>, scalar_prefetch = 0 : i64, scratch_operands = 1 : i64, tpu.core_type = #tpu.core_type<tc>, window_params = [{transform_indices = @transform_0, window_bounds = array<i64: 16, 32>}, {transform_indices = @transform_1, window_bounds = array<i64: 32, 96>}, {transform_indices = @transform_2, window_bounds = array<i64: 1, 96>}, {transform_indices = @transform_3, window_bounds = array<i64: 16, 96>}]} {
    %c0_i32 = arith.constant 0 : i32
    %0 = arith.cmpi eq, %arg2, %c0_i32 : i32
    %1 = arith.extui %0 : i1 to i32
    %c0_i32_0 = arith.constant 0 : i32
    %2 = arith.cmpi ne, %1, %c0_i32_0 : i32
    scf.if %2 {
      %cst_10 = arith.constant 0.000000e+00 : f32
      %12 = vector.broadcast %cst_10 : f32 to vector<16x96xf32>
      %c0_11 = arith.constant 0 : index
      %c0_12 = arith.constant 0 : index
      %13 = vector.load %arg7[%c0_11, %c0_12] : memref<16x96xf32, #tpu.memory_space<vmem>>, vector<16x96xf32>
      tpu.vector_store %arg7[%c0_11, %c0_12], %12 {strides = array<i32>} : memref<16x96xf32, #tpu.memory_space<vmem>>, vector<16x96xf32>,
    } else {
    }
    %c0 = arith.constant 0 : index
    %c0_1 = arith.constant 0 : index
    %3 = vector.load %arg7[%c0, %c0_1] : memref<16x96xf32, #tpu.memory_space<vmem>>, vector<16x96xf32>
    %c0_2 = arith.constant 0 : index
    %c0_3 = arith.constant 0 : index
    %4 = vector.load %arg3[%c0_2, %c0_3] : memref<16x32xbf16, #tpu.memory_space<vmem>>, vector<16x32xbf16>
    %c0_4 = arith.constant 0 : index
    %c0_5 = arith.constant 0 : index
    %5 = vector.load %arg4[%c0_4, %c0_5] : memref<32x96xbf16, #tpu.memory_space<vmem>>, vector<32x96xbf16>
    %cst = arith.constant dense<0.000000e+00> : vector<16x96xf32>
    %6 = tpu.matmul %4, %5, %cst {dimension_numbers = #tpu.dot_dimension_numbers<[1], [0], [0], [1], [0, 0, 1, 1], [], []>} : vector<16x32xbf16>, vector<32x96xbf16>, vector<16x96xf32> -> vector<16x96xf32>
    %7 = arith.addf %3, %6 : vector<16x96xf32>
    %c0_6 = arith.constant 0 : index
    %c0_7 = arith.constant 0 : index
    %8 = vector.load %arg7[%c0_6, %c0_7] : memref<16x96xf32, #tpu.memory_space<vmem>>, vector<16x96xf32>
    tpu.vector_store %arg7[%c0_6, %c0_7], %7 {strides = array<i32>} : memref<16x96xf32, #tpu.memory_space<vmem>>, vector<16x96xf32>,
    %c0_i32_8 = arith.constant 0 : i32
    %9 = arith.cmpi eq, %arg2, %c0_i32_8 : i32
    %10 = arith.extui %9 : i1 to i32
    %c0_i32_9 = arith.constant 0 : i32
    %11 = arith.cmpi ne, %10, %c0_i32_9 : i32
    scf.if %11 {
      %c0_10 = arith.constant 0 : index
      %c0_11 = arith.constant 0 : index
      %12 = vector.load %arg7[%c0_10, %c0_11] : memref<16x96xf32, #tpu.memory_space<vmem>>, vector<16x96xf32>
      %c0_12 = arith.constant 0 : index
      %c0_13 = arith.constant 0 : index
      %13 = vector.load %arg5[%c0_12, %c0_13] : memref<1x96xf32, #tpu.memory_space<vmem>>, vector<1x96xf32>
      %14 = vector.broadcast %13 : vector<1x96xf32> to vector<16x96xf32>
      %15 = arith.addf %12, %14 : vector<16x96xf32>
      %16 = arith.truncf %15 : vector<16x96xf32> to vector<16x96xbf16>
      %c0_14 = arith.constant 0 : index
      %c0_15 = arith.constant 0 : index
      %17 = vector.load %arg6[%c0_14, %c0_15] : memref<16x96xbf16, #tpu.memory_space<vmem>>, vector<16x96xbf16>
      tpu.vector_store %arg6[%c0_14, %c0_15], %16 {strides = array<i32>} : memref<16x96xbf16, #tpu.memory_space<vmem>>, vector<16x96xbf16>,
    } else {
    }
    return
  }
  func.func @transform_0(%arg0: i32, %arg1: i32, %arg2: i32) -> (i32, i32) {
    %c0_i32 = arith.constant 0 : i32
    return %arg0, %arg2 : i32, i32
  }
  func.func @transform_1(%arg0: i32, %arg1: i32, %arg2: i32) -> (i32, i32) {
    %c0_i32 = arith.constant 0 : i32
    return %arg2, %arg1 : i32, i32
  }
  func.func @transform_2(%arg0: i32, %arg1: i32, %arg2: i32) -> (i32, i32) {
    %c0_i32 = arith.constant 0 : i32
    %c0_i32_0 = arith.constant 0 : i32
    return %c0_i32, %arg1 : i32, i32
  }
  func.func @transform_3(%arg0: i32, %arg1: i32, %arg2: i32) -> (i32, i32) {
    %c0_i32 = arith.constant 0 : i32
    return %arg0, %arg1 : i32, i32
  }
}

module attributes {stable_mosaic.version = 11 : i64} {
  func.func @_layernorm_kernel(%arg0: i32, %arg1: memref<16x32xbf16, #tpu.memory_space<vmem>>, %arg2: memref<1x32xf32, #tpu.memory_space<vmem>>, %arg3: memref<1x32xf32, #tpu.memory_space<vmem>>, %arg4: memref<16x32xbf16, #tpu.memory_space<vmem>>) attributes {dimension_semantics = [#tpu.dimension_semantics<parallel>], iteration_bounds = array<i64: 1>, scalar_prefetch = 0 : i64, scratch_operands = 0 : i64, tpu.core_type = #tpu.core_type<tc>, window_params = [{transform_indices = @transform_0, window_bounds = array<i64: 16, 32>}, {pipeline_mode = #tpu.pipeline_mode<synchronous>, transform_indices = @transform_1, window_bounds = array<i64: 1, 32>}, {pipeline_mode = #tpu.pipeline_mode<synchronous>, transform_indices = @transform_2, window_bounds = array<i64: 1, 32>}, {transform_indices = @transform_3, window_bounds = array<i64: 16, 32>}]} {
    %c0 = arith.constant 0 : index
    %c0_0 = arith.constant 0 : index
    %0 = vector.load %arg1[%c0, %c0_0] : memref<16x32xbf16, #tpu.memory_space<vmem>>, vector<16x32xbf16>
    %1 = arith.extf %0 : vector<16x32xbf16> to vector<16x32xf32>
    %cst = arith.constant dense<0.000000e+00> : vector<16xf32>
    %2 = vector.multi_reduction <add>, %1, %cst [1] : vector<16x32xf32> to vector<16xf32>
    %3 = vector.shape_cast %2 : vector<16xf32> to vector<16x1xf32>
    %cst_1 = arith.constant 3.200000e+01 : f32
    %4 = vector.broadcast %cst_1 : f32 to vector<16x1xf32>
    %5 = arith.divf %3, %4 : vector<16x1xf32>
    %6 = vector.broadcast %5 : vector<16x1xf32> to vector<16x32xf32>
    %7 = arith.subf %1, %6 : vector<16x32xf32>
    %8 = arith.mulf %7, %7 : vector<16x32xf32>
    %cst_2 = arith.constant dense<0.000000e+00> : vector<16xf32>
    %9 = vector.multi_reduction <add>, %8, %cst_2 [1] : vector<16x32xf32> to vector<16xf32>
    %10 = vector.shape_cast %9 : vector<16xf32> to vector<16x1xf32>
    %cst_3 = arith.constant 3.200000e+01 : f32
    %11 = vector.broadcast %cst_3 : f32 to vector<16x1xf32>
    %12 = arith.divf %10, %11 : vector<16x1xf32>
    %cst_4 = arith.constant 9.99999996E-13 : f32
    %13 = vector.broadcast %cst_4 : f32 to vector<16x1xf32>
    %14 = arith.addf %12, %13 : vector<16x1xf32>
    %15 = math.rsqrt %14 : vector<16x1xf32>
    %16 = vector.broadcast %15 : vector<16x1xf32> to vector<16x32xf32>
    %17 = arith.mulf %7, %16 : vector<16x32xf32>
    %c0_5 = arith.constant 0 : index
    %c0_6 = arith.constant 0 : index
    %18 = vector.load %arg2[%c0_5, %c0_6] : memref<1x32xf32, #tpu.memory_space<vmem>>, vector<1x32xf32>
    %19 = vector.broadcast %18 : vector<1x32xf32> to vector<16x32xf32>
    %20 = arith.mulf %17, %19 : vector<16x32xf32>
    %c0_7 = arith.constant 0 : index
    %c0_8 = arith.constant 0 : index
    %21 = vector.load %arg3[%c0_7, %c0_8] : memref<1x32xf32, #tpu.memory_space<vmem>>, vector<1x32xf32>
    %22 = vector.broadcast %21 : vector<1x32xf32> to vector<16x32xf32>
    %23 = arith.addf %20, %22 : vector<16x32xf32>
    %24 = arith.truncf %23 : vector<16x32xf32> to vector<16x32xbf16>
    %c0_9 = arith.constant 0 : index
    %c0_10 = arith.constant 0 : index
    %25 = vector.load %arg4[%c0_9, %c0_10] : memref<16x32xbf16, #tpu.memory_space<vmem>>, vector<16x32xbf16>
    tpu.vector_store %arg4[%c0_9, %c0_10], %24 {strides = array<i32>} : memref<16x32xbf16, #tpu.memory_space<vmem>>, vector<16x32xbf16>,
    return
  }
  func.func @transform_0(%arg0: i32) -> (i32, i32) {
    %c0_i32 = arith.constant 0 : i32
    %c0_i32_0 = arith.constant 0 : i32
    return %arg0, %c0_i32 : i32, i32
  }
  func.func @transform_1(%arg0: i32) -> (i32, i32) {
    %c0_i32 = arith.constant 0 : i32
    %c0_i32_0 = arith.constant 0 : i32
    %c0_i32_1 = arith.constant 0 : i32
    return %c0_i32, %c0_i32_0 : i32, i32
  }
  func.func @transform_2(%arg0: i32) -> (i32, i32) {
    %c0_i32 = arith.constant 0 : i32
    %c0_i32_0 = arith.constant 0 : i32
    %c0_i32_1 = arith.constant 0 : i32
    return %c0_i32, %c0_i32_0 : i32, i32
  }
  func.func @transform_3(%arg0: i32) -> (i32, i32) {
    %c0_i32 = arith.constant 0 : i32
    %c0_i32_0 = arith.constant 0 : i32
    return %arg0, %c0_i32 : i32, i32
  }
}

module attributes {stable_mosaic.version = 11 : i64} {
  func.func @_flash_attn_kernel(%arg0: i32, %arg1: i32, %arg2: i32, %arg3: memref<1x1x8x16xbf16, #tpu.memory_space<vmem>>, %arg4: memref<1x1x8x16xbf16, #tpu.memory_space<vmem>>, %arg5: memref<1x1x8x16xbf16, #tpu.memory_space<vmem>>, %arg6: memref<1x1x8xf32, #tpu.memory_space<vmem>>, %arg7: memref<1x1x8x16xbf16, #tpu.memory_space<vmem>>, %arg8: memref<8x1xf32, #tpu.memory_space<vmem>>, %arg9: memref<8x1xf32, #tpu.memory_space<vmem>>, %arg10: memref<8x16xf32, #tpu.memory_space<vmem>>) attributes {dimension_semantics = [#tpu.dimension_semantics<parallel>, #tpu.dimension_semantics<parallel>, #tpu.dimension_semantics<arbitrary>], iteration_bounds = array<i64: 2, 2, 1>, scalar_prefetch = 0 : i64, scratch_operands = 3 : i64, tpu.core_type = #tpu.core_type<tc>, window_params = [{transform_indices = @transform_0, window_bounds = array<i64: 1, 1, 8, 16>}, {transform_indices = @transform_1, window_bounds = array<i64: 1, 1, 8, 16>}, {transform_indices = @transform_2, window_bounds = array<i64: 1, 1, 8, 16>}, {transform_indices = @transform_3, window_bounds = array<i64: 1, 1, 8>}, {transform_indices = @transform_4, window_bounds = array<i64: 1, 1, 8, 16>}]} {
    %c0_i32 = arith.constant 0 : i32
    %0 = arith.cmpi eq, %arg2, %c0_i32 : i32
    %1 = arith.extui %0 : i1 to i32
    %c0_i32_0 = arith.constant 0 : i32
    %2 = arith.cmpi ne, %1, %c0_i32_0 : i32
    scf.if %2 {
      %cst_35 = arith.constant 0xFF800000 : f32
      %43 = vector.broadcast %cst_35 : f32 to vector<8x1xf32>
      %c0_36 = arith.constant 0 : index
      %c0_37 = arith.constant 0 : index
      %44 = vector.load %arg8[%c0_36, %c0_37] : memref<8x1xf32, #tpu.memory_space<vmem>>, vector<8x1xf32>
      tpu.vector_store %arg8[%c0_36, %c0_37], %43 {strides = array<i32>} : memref<8x1xf32, #tpu.memory_space<vmem>>, vector<8x1xf32>,
      %cst_38 = arith.constant 0.000000e+00 : f32
      %45 = vector.broadcast %cst_38 : f32 to vector<8x1xf32>
      %c0_39 = arith.constant 0 : index
      %c0_40 = arith.constant 0 : index
      %46 = vector.load %arg9[%c0_39, %c0_40] : memref<8x1xf32, #tpu.memory_space<vmem>>, vector<8x1xf32>
      tpu.vector_store %arg9[%c0_39, %c0_40], %45 {strides = array<i32>} : memref<8x1xf32, #tpu.memory_space<vmem>>, vector<8x1xf32>,
      %cst_41 = arith.constant 0.000000e+00 : f32
      %47 = vector.broadcast %cst_41 : f32 to vector<8x16xf32>
      %c0_42 = arith.constant 0 : index
      %c0_43 = arith.constant 0 : index
      %48 = vector.load %arg10[%c0_42, %c0_43] : memref<8x16xf32, #tpu.memory_space<vmem>>, vector<8x16xf32>
      tpu.vector_store %arg10[%c0_42, %c0_43], %47 {strides = array<i32>} : memref<8x16xf32, #tpu.memory_space<vmem>>, vector<8x16xf32>,
    } else {
    }
    %c0 = arith.constant 0 : index
    %c0_1 = arith.constant 0 : index
    %c0_2 = arith.constant 0 : index
    %c0_3 = arith.constant 0 : index
    %3 = vector.load %arg3[%c0, %c0_1, %c0_2, %c0_3] : memref<1x1x8x16xbf16, #tpu.memory_space<vmem>>, vector<1x1x8x16xbf16>
    %4 = vector.shape_cast %3 : vector<1x1x8x16xbf16> to vector<8x16xbf16>
    %c0_4 = arith.constant 0 : index
    %c0_5 = arith.constant 0 : index
    %c0_6 = arith.constant 0 : index
    %c0_7 = arith.constant 0 : index
    %5 = vector.load %arg4[%c0_4, %c0_5, %c0_6, %c0_7] : memref<1x1x8x16xbf16, #tpu.memory_space<vmem>>, vector<1x1x8x16xbf16>
    %6 = vector.shape_cast %5 : vector<1x1x8x16xbf16> to vector<8x16xbf16>
    %c0_8 = arith.constant 0 : index
    %c0_9 = arith.constant 0 : index
    %c0_10 = arith.constant 0 : index
    %c0_11 = arith.constant 0 : index
    %7 = vector.load %arg5[%c0_8, %c0_9, %c0_10, %c0_11] : memref<1x1x8x16xbf16, #tpu.memory_space<vmem>>, vector<1x1x8x16xbf16>
    %8 = vector.shape_cast %7 : vector<1x1x8x16xbf16> to vector<8x16xbf16>
    %c0_12 = arith.constant 0 : index
    %c0_13 = arith.constant 0 : index
    %c0_14 = arith.constant 0 : index
    %9 = vector.load %arg6[%c0_12, %c0_13, %c0_14] : memref<1x1x8xf32, #tpu.memory_space<vmem>>, vector<1x1x8xf32>
    %10 = vector.shape_cast %9 : vector<1x1x8xf32> to vector<1x8xf32>
    %cst = arith.constant dense<0.000000e+00> : vector<8x8xf32>
    %11 = tpu.matmul %4, %6, %cst {dimension_numbers = #tpu.dot_dimension_numbers<[1], [1], [0], [0], [0, 0, 1, 0], [], []>} : vector<8x16xbf16>, vector<8x16xbf16>, vector<8x8xf32> -> vector<8x8xf32>
    %cst_15 = arith.constant 2.500000e-01 : f32
    %12 = vector.broadcast %cst_15 : f32 to vector<8x8xf32>
    %13 = arith.mulf %11, %12 : vector<8x8xf32>
    %14 = vector.broadcast %10 : vector<1x8xf32> to vector<8x8xf32>
    %15 = arith.addf %13, %14 : vector<8x8xf32>
    %c0_16 = arith.constant 0 : index
    %c0_17 = arith.constant 0 : index
    %16 = vector.load %arg8[%c0_16, %c0_17] : memref<8x1xf32, #tpu.memory_space<vmem>>, vector<8x1xf32>
    %cst_18 = arith.constant dense<0xFF800000> : vector<8xf32>
    %17 = vector.multi_reduction <maximumf>, %15, %cst_18 [1] : vector<8x8xf32> to vector<8xf32>
    %18 = vector.shape_cast %17 : vector<8xf32> to vector<8x1xf32>
    %19 = arith.maximumf %16, %18 : vector<8x1xf32>
    %c0_19 = arith.constant 0 : index
    %c0_20 = arith.constant 0 : index
    %20 = vector.load %arg8[%c0_19, %c0_20] : memref<8x1xf32, #tpu.memory_space<vmem>>, vector<8x1xf32>
    %21 = arith.subf %20, %19 : vector<8x1xf32>
    %22 = math.exp %21 : vector<8x1xf32>
    %23 = vector.broadcast %19 : vector<8x1xf32> to vector<8x8xf32>
    %24 = arith.subf %15, %23 : vector<8x8xf32>
    %25 = math.exp %24 : vector<8x8xf32>
    %c0_21 = arith.constant 0 : index
    %c0_22 = arith.constant 0 : index
    %26 = vector.load %arg9[%c0_21, %c0_22] : memref<8x1xf32, #tpu.memory_space<vmem>>, vector<8x1xf32>
    %27 = arith.mulf %22, %26 : vector<8x1xf32>
    %cst_23 = arith.constant dense<0.000000e+00> : vector<8xf32>
    %28 = vector.multi_reduction <add>, %25, %cst_23 [1] : vector<8x8xf32> to vector<8xf32>
    %29 = vector.shape_cast %28 : vector<8xf32> to vector<8x1xf32>
    %30 = arith.addf %27, %29 : vector<8x1xf32>
    %c0_24 = arith.constant 0 : index
    %c0_25 = arith.constant 0 : index
    %31 = vector.load %arg9[%c0_24, %c0_25] : memref<8x1xf32, #tpu.memory_space<vmem>>, vector<8x1xf32>
    tpu.vector_store %arg9[%c0_24, %c0_25], %30 {strides = array<i32>} : memref<8x1xf32, #tpu.memory_space<vmem>>, vector<8x1xf32>,
    %c0_26 = arith.constant 0 : index
    %c0_27 = arith.constant 0 : index
    %32 = vector.load %arg10[%c0_26, %c0_27] : memref<8x16xf32, #tpu.memory_space<vmem>>, vector<8x16xf32>
    %33 = vector.broadcast %22 : vector<8x1xf32> to vector<8x16xf32>
    %34 = arith.mulf %33, %32 : vector<8x16xf32>
    %35 = arith.truncf %25 : vector<8x8xf32> to vector<8x8xbf16>
    %cst_28 = arith.constant dense<0.000000e+00> : vector<8x16xf32>
    %36 = tpu.matmul %35, %8, %cst_28 {dimension_numbers = #tpu.dot_dimension_numbers<[1], [0], [0], [1], [0, 0, 1, 1], [], []>} : vector<8x8xbf16>, vector<8x16xbf16>, vector<8x16xf32> -> vector<8x16xf32>
    %37 = arith.addf %34, %36 : vector<8x16xf32>
    %c0_29 = arith.constant 0 : index
    %c0_30 = arith.constant 0 : index
    %38 = vector.load %arg10[%c0_29, %c0_30] : memref<8x16xf32, #tpu.memory_space<vmem>>, vector<8x16xf32>
    tpu.vector_store %arg10[%c0_29, %c0_30], %37 {strides = array<i32>} : memref<8x16xf32, #tpu.memory_space<vmem>>, vector<8x16xf32>,
    %c0_31 = arith.constant 0 : index
    %c0_32 = arith.constant 0 : index
    %39 = vector.load %arg8[%c0_31, %c0_32] : memref<8x1xf32, #tpu.memory_space<vmem>>, vector<8x1xf32>
    tpu.vector_store %arg8[%c0_31, %c0_32], %19 {strides = array<i32>} : memref<8x1xf32, #tpu.memory_space<vmem>>, vector<8x1xf32>,
    %c0_i32_33 = arith.constant 0 : i32
    %40 = arith.cmpi eq, %arg2, %c0_i32_33 : i32
    %41 = arith.extui %40 : i1 to i32
    %c0_i32_34 = arith.constant 0 : i32
    %42 = arith.cmpi ne, %41, %c0_i32_34 : i32
    scf.if %42 {
      %c0_35 = arith.constant 0 : index
      %c0_36 = arith.constant 0 : index
      %43 = vector.load %arg10[%c0_35, %c0_36] : memref<8x16xf32, #tpu.memory_space<vmem>>, vector<8x16xf32>
      %c0_37 = arith.constant 0 : index
      %c0_38 = arith.constant 0 : index
      %44 = vector.load %arg9[%c0_37, %c0_38] : memref<8x1xf32, #tpu.memory_space<vmem>>, vector<8x1xf32>
      %45 = vector.broadcast %44 : vector<8x1xf32> to vector<8x16xf32>
      %46 = arith.divf %43, %45 : vector<8x16xf32>
      %47 = arith.truncf %46 : vector<8x16xf32> to vector<8x16xbf16>
      %c0_39 = arith.constant 0 : index
      %c0_40 = arith.constant 0 : index
      %c0_41 = arith.constant 0 : index
      %c0_42 = arith.constant 0 : index
      %48 = vector.load %arg7[%c0_39, %c0_40, %c0_41, %c0_42] : memref<1x1x8x16xbf16, #tpu.memory_space<vmem>>, vector<1x1x8x16xbf16>
      %49 = vector.shape_cast %48 : vector<1x1x8x16xbf16> to vector<8x16xbf16>
      %50 = vector.shape_cast %47 : vector<8x16xbf16> to vector<1x1x8x16xbf16>
      tpu.vector_store %arg7[%c0_39, %c0_40, %c0_41, %c0_42], %50 {strides = array<i32>} : memref<1x1x8x16xbf16, #tpu.memory_space<vmem>>, vector<1x1x8x16xbf16>,
    } else {
    }
    return
  }
  func.func @transform_0(%arg0: i32, %arg1: i32, %arg2: i32) -> (i32, i32, i32, i32) {
    %c0_i32 = arith.constant 0 : i32
    %c0_i32_0 = arith.constant 0 : i32
    %c0_i32_1 = arith.constant 0 : i32
    return %arg0, %arg1, %c0_i32, %c0_i32_0 : i32, i32, i32, i32
  }
  func.func @transform_1(%arg0: i32, %arg1: i32, %arg2: i32) -> (i32, i32, i32, i32) {
    %c0_i32 = arith.constant 0 : i32
    %c0_i32_0 = arith.constant 0 : i32
    return %arg0, %arg1, %arg2, %c0_i32 : i32, i32, i32, i32
  }
  func.func @transform_2(%arg0: i32, %arg1: i32, %arg2: i32) -> (i32, i32, i32, i32) {
    %c0_i32 = arith.constant 0 : i32
    %c0_i32_0 = arith.constant 0 : i32
    return %arg0, %arg1, %arg2, %c0_i32 : i32, i32, i32, i32
  }
  func.func @transform_3(%arg0: i32, %arg1: i32, %arg2: i32) -> (i32, i32, i32) {
    %c0_i32 = arith.constant 0 : i32
    %c0_i32_0 = arith.constant 0 : i32
    return %arg0, %c0_i32, %arg2 : i32, i32, i32
  }
  func.func @transform_4(%arg0: i32, %arg1: i32, %arg2: i32) -> (i32, i32, i32, i32) {
    %c0_i32 = arith.constant 0 : i32
    %c0_i32_0 = arith.constant 0 : i32
    %c0_i32_1 = arith.constant 0 : i32
    return %arg0, %arg1, %c0_i32, %c0_i32_0 : i32, i32, i32, i32
  }
}

module attributes {stable_mosaic.version = 11 : i64} {
  func.func @_dense_res_ln_kernel(%arg0: i32, %arg1: i32, %arg2: memref<16x32xbf16, #tpu.memory_space<vmem>>, %arg3: memref<32x32xbf16, #tpu.memory_space<vmem>>, %arg4: memref<1x32xf32, #tpu.memory_space<vmem>>, %arg5: memref<16x32xbf16, #tpu.memory_space<vmem>>, %arg6: memref<1x32xf32, #tpu.memory_space<vmem>>, %arg7: memref<1x32xf32, #tpu.memory_space<vmem>>, %arg8: memref<16x32xbf16, #tpu.memory_space<vmem>>, %arg9: memref<16x32xf32, #tpu.memory_space<vmem>>) attributes {dimension_semantics = [#tpu.dimension_semantics<parallel>, #tpu.dimension_semantics<arbitrary>], iteration_bounds = array<i64: 1, 1>, scalar_prefetch = 0 : i64, scratch_operands = 1 : i64, tpu.core_type = #tpu.core_type<tc>, window_params = [{transform_indices = @transform_0, window_bounds = array<i64: 16, 32>}, {transform_indices = @transform_1, window_bounds = array<i64: 32, 32>}, {pipeline_mode = #tpu.pipeline_mode<synchronous>, transform_indices = @transform_2, window_bounds = array<i64: 1, 32>}, {transform_indices = @transform_3, window_bounds = array<i64: 16, 32>}, {pipeline_mode = #tpu.pipeline_mode<synchronous>, transform_indices = @transform_4, window_bounds = array<i64: 1, 32>}, {pipeline_mode = #tpu.pipeline_mode<synchronous>, transform_indices = @transform_5, window_bounds = array<i64: 1, 32>}, {transform_indices = @transform_6, window_bounds = array<i64: 16, 32>}]} {
    %c0_i32 = arith.constant 0 : i32
    %0 = arith.cmpi eq, %arg1, %c0_i32 : i32
    %1 = arith.extui %0 : i1 to i32
    %c0_i32_0 = arith.constant 0 : i32
    %2 = arith.cmpi ne, %1, %c0_i32_0 : i32
    scf.if %2 {
      %cst_10 = arith.constant 0.000000e+00 : f32
      %12 = vector.broadcast %cst_10 : f32 to vector<16x32xf32>
      %c0_11 = arith.constant 0 : index
      %c0_12 = arith.constant 0 : index
      %13 = vector.load %arg9[%c0_11, %c0_12] : memref<16x32xf32, #tpu.memory_space<vmem>>, vector<16x32xf32>
      tpu.vector_store %arg9[%c0_11, %c0_12], %12 {strides = array<i32>} : memref<16x32xf32, #tpu.memory_space<vmem>>, vector<16x32xf32>,
    } else {
    }
    %c0 = arith.constant 0 : index
    %c0_1 = arith.constant 0 : index
    %3 = vector.load %arg9[%c0, %c0_1] : memref<16x32xf32, #tpu.memory_space<vmem>>, vector<16x32xf32>
    %c0_2 = arith.constant 0 : index
    %c0_3 = arith.constant 0 : index
    %4 = vector.load %arg2[%c0_2, %c0_3] : memref<16x32xbf16, #tpu.memory_space<vmem>>, vector<16x32xbf16>
    %c0_4 = arith.constant 0 : index
    %c0_5 = arith.constant 0 : index
    %5 = vector.load %arg3[%c0_4, %c0_5] : memref<32x32xbf16, #tpu.memory_space<vmem>>, vector<32x32xbf16>
    %cst = arith.constant dense<0.000000e+00> : vector<16x32xf32>
    %6 = tpu.matmul %4, %5, %cst {dimension_numbers = #tpu.dot_dimension_numbers<[1], [0], [0], [1], [0, 0, 1, 1], [], []>} : vector<16x32xbf16>, vector<32x32xbf16>, vector<16x32xf32> -> vector<16x32xf32>
    %7 = arith.addf %3, %6 : vector<16x32xf32>
    %c0_6 = arith.constant 0 : index
    %c0_7 = arith.constant 0 : index
    %8 = vector.load %arg9[%c0_6, %c0_7] : memref<16x32xf32, #tpu.memory_space<vmem>>, vector<16x32xf32>
    tpu.vector_store %arg9[%c0_6, %c0_7], %7 {strides = array<i32>} : memref<16x32xf32, #tpu.memory_space<vmem>>, vector<16x32xf32>,
    %c0_i32_8 = arith.constant 0 : i32
    %9 = arith.cmpi eq, %arg1, %c0_i32_8 : i32
    %10 = arith.extui %9 : i1 to i32
    %c0_i32_9 = arith.constant 0 : i32
    %11 = arith.cmpi ne, %10, %c0_i32_9 : i32
    scf.if %11 {
      %c0_10 = arith.constant 0 : index
      %c0_11 = arith.constant 0 : index
      %12 = vector.load %arg9[%c0_10, %c0_11] : memref<16x32xf32, #tpu.memory_space<vmem>>, vector<16x32xf32>
      %c0_12 = arith.constant 0 : index
      %c0_13 = arith.constant 0 : index
      %13 = vector.load %arg4[%c0_12, %c0_13] : memref<1x32xf32, #tpu.memory_space<vmem>>, vector<1x32xf32>
      %14 = vector.broadcast %13 : vector<1x32xf32> to vector<16x32xf32>
      %15 = arith.addf %12, %14 : vector<16x32xf32>
      %c0_14 = arith.constant 0 : index
      %c0_15 = arith.constant 0 : index
      %16 = vector.load %arg5[%c0_14, %c0_15] : memref<16x32xbf16, #tpu.memory_space<vmem>>, vector<16x32xbf16>
      %17 = arith.extf %16 : vector<16x32xbf16> to vector<16x32xf32>
      %18 = arith.addf %15, %17 : vector<16x32xf32>
      %cst_16 = arith.constant dense<0.000000e+00> : vector<16xf32>
      %19 = vector.multi_reduction <add>, %18, %cst_16 [1] : vector<16x32xf32> to vector<16xf32>
      %20 = vector.shape_cast %19 : vector<16xf32> to vector<16x1xf32>
      %cst_17 = arith.constant 3.200000e+01 : f32
      %21 = vector.broadcast %cst_17 : f32 to vector<16x1xf32>
      %22 = arith.divf %20, %21 : vector<16x1xf32>
      %23 = vector.broadcast %22 : vector<16x1xf32> to vector<16x32xf32>
      %24 = arith.subf %18, %23 : vector<16x32xf32>
      %25 = arith.mulf %24, %24 : vector<16x32xf32>
      %cst_18 = arith.constant dense<0.000000e+00> : vector<16xf32>
      %26 = vector.multi_reduction <add>, %25, %cst_18 [1] : vector<16x32xf32> to vector<16xf32>
      %27 = vector.shape_cast %26 : vector<16xf32> to vector<16x1xf32>
      %cst_19 = arith.constant 3.200000e+01 : f32
      %28 = vector.broadcast %cst_19 : f32 to vector<16x1xf32>
      %29 = arith.divf %27, %28 : vector<16x1xf32>
      %cst_20 = arith.constant 9.99999996E-13 : f32
      %30 = vector.broadcast %cst_20 : f32 to vector<16x1xf32>
      %31 = arith.addf %29, %30 : vector<16x1xf32>
      %32 = math.rsqrt %31 : vector<16x1xf32>
      %33 = vector.broadcast %32 : vector<16x1xf32> to vector<16x32xf32>
      %34 = arith.mulf %24, %33 : vector<16x32xf32>
      %c0_21 = arith.constant 0 : index
      %c0_22 = arith.constant 0 : index
      %35 = vector.load %arg6[%c0_21, %c0_22] : memref<1x32xf32, #tpu.memory_space<vmem>>, vector<1x32xf32>
      %36 = vector.broadcast %35 : vector<1x32xf32> to vector<16x32xf32>
      %37 = arith.mulf %34, %36 : vector<16x32xf32>
      %c0_23 = arith.constant 0 : index
      %c0_24 = arith.constant 0 : index
      %38 = vector.load %arg7[%c0_23, %c0_24] : memref<1x32xf32, #tpu.memory_space<vmem>>, vector<1x32xf32>
      %39 = vector.broadcast %38 : vector<1x32xf32> to vector<16x32xf32>
      %40 = arith.addf %37, %39 : vector<16x32xf32>
      %41 = arith.truncf %40 : vector<16x32xf32> to vector<16x32xbf16>
      %c0_25 = arith.constant 0 : index
      %c0_26 = arith.constant 0 : index
      %42 = vector.load %arg8[%c0_25, %c0_26] : memref<16x32xbf16, #tpu.memory_space<vmem>>, vector<16x32xbf16>
      tpu.vector_store %arg8[%c0_25, %c0_26], %41 {strides = array<i32>} : memref<16x32xbf16, #tpu.memory_space<vmem>>, vector<16x32xbf16>,
    } else {
    }
    return
  }
  func.func @transform_0(%arg0: i32, %arg1: i32) -> (i32, i32) {
    %c0_i32 = arith.constant 0 : i32
    return %arg0, %arg1 : i32, i32
  }
  func.func @transform_1(%arg0: i32, %arg1: i32) -> (i32, i32) {
    %c0_i32 = arith.constant 0 : i32
    %c0_i32_0 = arith.constant 0 : i32
    return %arg1, %c0_i32 : i32, i32
  }
  func.func @transform_2(%arg0: i32, %arg1: i32) -> (i32, i32) {
    %c0_i32 = arith.constant 0 : i32
    %c0_i32_0 = arith.constant 0 : i32
    %c0_i32_1 = arith.constant 0 : i32
    return %c0_i32, %c0_i32_0 : i32, i32
  }
  func.func @transform_3(%arg0: i32, %arg1: i32) -> (i32, i32) {
    %c0_i32 = arith.constant 0 : i32
    %c0_i32_0 = arith.constant 0 : i32
    return %arg0, %c0_i32 : i32, i32
  }
  func.func @transform_4(%arg0: i32, %arg1: i32) -> (i32, i32) {
    %c0_i32 = arith.constant 0 : i32
    %c0_i32_0 = arith.constant 0 : i32
    %c0_i32_1 = arith.constant 0 : i32
    return %c0_i32, %c0_i32_0 : i32, i32
  }
  func.func @transform_5(%arg0: i32, %arg1: i32) -> (i32, i32) {
    %c0_i32 = arith.constant 0 : i32
    %c0_i32_0 = arith.constant 0 : i32
    %c0_i32_1 = arith.constant 0 : i32
    return %c0_i32, %c0_i32_0 : i32, i32
  }
  func.func @transform_6(%arg0: i32, %arg1: i32) -> (i32, i32) {
    %c0_i32 = arith.constant 0 : i32
    %c0_i32_0 = arith.constant 0 : i32
    return %arg0, %c0_i32 : i32, i32
  }
}

module attributes {stable_mosaic.version = 11 : i64} {
  func.func @_dense_kernel(%arg0: i32, %arg1: i32, %arg2: i32, %arg3: memref<16x32xbf16, #tpu.memory_space<vmem>>, %arg4: memref<32x64xbf16, #tpu.memory_space<vmem>>, %arg5: memref<1x64xf32, #tpu.memory_space<vmem>>, %arg6: memref<16x64xbf16, #tpu.memory_space<vmem>>, %arg7: memref<16x64xf32, #tpu.memory_space<vmem>>) attributes {dimension_semantics = [#tpu.dimension_semantics<parallel>, #tpu.dimension_semantics<parallel>, #tpu.dimension_semantics<arbitrary>], iteration_bounds = array<i64: 1, 1, 1>, scalar_prefetch = 0 : i64, scratch_operands = 1 : i64, tpu.core_type = #tpu.core_type<tc>, window_params = [{transform_indices = @transform_0, window_bounds = array<i64: 16, 32>}, {transform_indices = @transform_1, window_bounds = array<i64: 32, 64>}, {transform_indices = @transform_2, window_bounds = array<i64: 1, 64>}, {transform_indices = @transform_3, window_bounds = array<i64: 16, 64>}]} {
    %c0_i32 = arith.constant 0 : i32
    %0 = arith.cmpi eq, %arg2, %c0_i32 : i32
    %1 = arith.extui %0 : i1 to i32
    %c0_i32_0 = arith.constant 0 : i32
    %2 = arith.cmpi ne, %1, %c0_i32_0 : i32
    scf.if %2 {
      %cst_10 = arith.constant 0.000000e+00 : f32
      %12 = vector.broadcast %cst_10 : f32 to vector<16x64xf32>
      %c0_11 = arith.constant 0 : index
      %c0_12 = arith.constant 0 : index
      %13 = vector.load %arg7[%c0_11, %c0_12] : memref<16x64xf32, #tpu.memory_space<vmem>>, vector<16x64xf32>
      tpu.vector_store %arg7[%c0_11, %c0_12], %12 {strides = array<i32>} : memref<16x64xf32, #tpu.memory_space<vmem>>, vector<16x64xf32>,
    } else {
    }
    %c0 = arith.constant 0 : index
    %c0_1 = arith.constant 0 : index
    %3 = vector.load %arg7[%c0, %c0_1] : memref<16x64xf32, #tpu.memory_space<vmem>>, vector<16x64xf32>
    %c0_2 = arith.constant 0 : index
    %c0_3 = arith.constant 0 : index
    %4 = vector.load %arg3[%c0_2, %c0_3] : memref<16x32xbf16, #tpu.memory_space<vmem>>, vector<16x32xbf16>
    %c0_4 = arith.constant 0 : index
    %c0_5 = arith.constant 0 : index
    %5 = vector.load %arg4[%c0_4, %c0_5] : memref<32x64xbf16, #tpu.memory_space<vmem>>, vector<32x64xbf16>
    %cst = arith.constant dense<0.000000e+00> : vector<16x64xf32>
    %6 = tpu.matmul %4, %5, %cst {dimension_numbers = #tpu.dot_dimension_numbers<[1], [0], [0], [1], [0, 0, 1, 1], [], []>} : vector<16x32xbf16>, vector<32x64xbf16>, vector<16x64xf32> -> vector<16x64xf32>
    %7 = arith.addf %3, %6 : vector<16x64xf32>
    %c0_6 = arith.constant 0 : index
    %c0_7 = arith.constant 0 : index
    %8 = vector.load %arg7[%c0_6, %c0_7] : memref<16x64xf32, #tpu.memory_space<vmem>>, vector<16x64xf32>
    tpu.vector_store %arg7[%c0_6, %c0_7], %7 {strides = array<i32>} : memref<16x64xf32, #tpu.memory_space<vmem>>, vector<16x64xf32>,
    %c0_i32_8 = arith.constant 0 : i32
    %9 = arith.cmpi eq, %arg2, %c0_i32_8 : i32
    %10 = arith.extui %9 : i1 to i32
    %c0_i32_9 = arith.constant 0 : i32
    %11 = arith.cmpi ne, %10, %c0_i32_9 : i32
    scf.if %11 {
      %c0_10 = arith.constant 0 : index
      %c0_11 = arith.constant 0 : index
      %12 = vector.load %arg7[%c0_10, %c0_11] : memref<16x64xf32, #tpu.memory_space<vmem>>, vector<16x64xf32>
      %c0_12 = arith.constant 0 : index
      %c0_13 = arith.constant 0 : index
      %13 = vector.load %arg5[%c0_12, %c0_13] : memref<1x64xf32, #tpu.memory_space<vmem>>, vector<1x64xf32>
      %14 = vector.broadcast %13 : vector<1x64xf32> to vector<16x64xf32>
      %15 = arith.addf %12, %14 : vector<16x64xf32>
      %cst_14 = arith.constant 5.000000e-01 : f32
      %16 = vector.broadcast %cst_14 : f32 to vector<16x64xf32>
      %17 = arith.mulf %16, %15 : vector<16x64xf32>
      %cst_15 = arith.constant 4.471500e-02 : f32
      %18 = vector.broadcast %cst_15 : f32 to vector<16x64xf32>
      %19 = arith.mulf %18, %15 : vector<16x64xf32>
      %20 = arith.mulf %19, %15 : vector<16x64xf32>
      %21 = arith.mulf %20, %15 : vector<16x64xf32>
      %22 = arith.addf %15, %21 : vector<16x64xf32>
      %cst_16 = arith.constant 0.797884583 : f32
      %23 = vector.broadcast %cst_16 : f32 to vector<16x64xf32>
      %24 = arith.mulf %23, %22 : vector<16x64xf32>
      %25 = math.tanh %24 : vector<16x64xf32>
      %cst_17 = arith.constant 1.000000e+00 : f32
      %26 = vector.broadcast %cst_17 : f32 to vector<16x64xf32>
      %27 = arith.addf %26, %25 : vector<16x64xf32>
      %28 = arith.mulf %17, %27 : vector<16x64xf32>
      %29 = arith.truncf %28 : vector<16x64xf32> to vector<16x64xbf16>
      %c0_18 = arith.constant 0 : index
      %c0_19 = arith.constant 0 : index
      %30 = vector.load %arg6[%c0_18, %c0_19] : memref<16x64xbf16, #tpu.memory_space<vmem>>, vector<16x64xbf16>
      tpu.vector_store %arg6[%c0_18, %c0_19], %29 {strides = array<i32>} : memref<16x64xbf16, #tpu.memory_space<vmem>>, vector<16x64xbf16>,
    } else {
    }
    return
  }
  func.func @transform_0(%arg0: i32, %arg1: i32, %arg2: i32) -> (i32, i32) {
    %c0_i32 = arith.constant 0 : i32
    return %arg0, %arg2 : i32, i32
  }
  func.func @transform_1(%arg0: i32, %arg1: i32, %arg2: i32) -> (i32, i32) {
    %c0_i32 = arith.constant 0 : i32
    return %arg2, %arg1 : i32, i32
  }
  func.func @transform_2(%arg0: i32, %arg1: i32, %arg2: i32) -> (i32, i32) {
    %c0_i32 = arith.constant 0 : i32
    %c0_i32_0 = arith.constant 0 : i32
    return %c0_i32, %arg1 : i32, i32
  }
  func.func @transform_3(%arg0: i32, %arg1: i32, %arg2: i32) -> (i32, i32) {
    %c0_i32 = arith.constant 0 : i32
    return %arg0, %arg1 : i32, i32
  }
}

module attributes {stable_mosaic.version = 11 : i64} {
  func.func @_dense_res_ln_kernel(%arg0: i32, %arg1: i32, %arg2: memref<16x64xbf16, #tpu.memory_space<vmem>>, %arg3: memref<64x32xbf16, #tpu.memory_space<vmem>>, %arg4: memref<1x32xf32, #tpu.memory_space<vmem>>, %arg5: memref<16x32xbf16, #tpu.memory_space<vmem>>, %arg6: memref<1x32xf32, #tpu.memory_space<vmem>>, %arg7: memref<1x32xf32, #tpu.memory_space<vmem>>, %arg8: memref<16x32xbf16, #tpu.memory_space<vmem>>, %arg9: memref<16x32xf32, #tpu.memory_space<vmem>>) attributes {dimension_semantics = [#tpu.dimension_semantics<parallel>, #tpu.dimension_semantics<arbitrary>], iteration_bounds = array<i64: 1, 1>, scalar_prefetch = 0 : i64, scratch_operands = 1 : i64, tpu.core_type = #tpu.core_type<tc>, window_params = [{transform_indices = @transform_0, window_bounds = array<i64: 16, 64>}, {transform_indices = @transform_1, window_bounds = array<i64: 64, 32>}, {pipeline_mode = #tpu.pipeline_mode<synchronous>, transform_indices = @transform_2, window_bounds = array<i64: 1, 32>}, {transform_indices = @transform_3, window_bounds = array<i64: 16, 32>}, {pipeline_mode = #tpu.pipeline_mode<synchronous>, transform_indices = @transform_4, window_bounds = array<i64: 1, 32>}, {pipeline_mode = #tpu.pipeline_mode<synchronous>, transform_indices = @transform_5, window_bounds = array<i64: 1, 32>}, {transform_indices = @transform_6, window_bounds = array<i64: 16, 32>}]} {
    %c0_i32 = arith.constant 0 : i32
    %0 = arith.cmpi eq, %arg1, %c0_i32 : i32
    %1 = arith.extui %0 : i1 to i32
    %c0_i32_0 = arith.constant 0 : i32
    %2 = arith.cmpi ne, %1, %c0_i32_0 : i32
    scf.if %2 {
      %cst_10 = arith.constant 0.000000e+00 : f32
      %12 = vector.broadcast %cst_10 : f32 to vector<16x32xf32>
      %c0_11 = arith.constant 0 : index
      %c0_12 = arith.constant 0 : index
      %13 = vector.load %arg9[%c0_11, %c0_12] : memref<16x32xf32, #tpu.memory_space<vmem>>, vector<16x32xf32>
      tpu.vector_store %arg9[%c0_11, %c0_12], %12 {strides = array<i32>} : memref<16x32xf32, #tpu.memory_space<vmem>>, vector<16x32xf32>,
    } else {
    }
    %c0 = arith.constant 0 : index
    %c0_1 = arith.constant 0 : index
    %3 = vector.load %arg9[%c0, %c0_1] : memref<16x32xf32, #tpu.memory_space<vmem>>, vector<16x32xf32>
    %c0_2 = arith.constant 0 : index
    %c0_3 = arith.constant 0 : index
    %4 = vector.load %arg2[%c0_2, %c0_3] : memref<16x64xbf16, #tpu.memory_space<vmem>>, vector<16x64xbf16>
    %c0_4 = arith.constant 0 : index
    %c0_5 = arith.constant 0 : index
    %5 = vector.load %arg3[%c0_4, %c0_5] : memref<64x32xbf16, #tpu.memory_space<vmem>>, vector<64x32xbf16>
    %cst = arith.constant dense<0.000000e+00> : vector<16x32xf32>
    %6 = tpu.matmul %4, %5, %cst {dimension_numbers = #tpu.dot_dimension_numbers<[1], [0], [0], [1], [0, 0, 1, 1], [], []>} : vector<16x64xbf16>, vector<64x32xbf16>, vector<16x32xf32> -> vector<16x32xf32>
    %7 = arith.addf %3, %6 : vector<16x32xf32>
    %c0_6 = arith.constant 0 : index
    %c0_7 = arith.constant 0 : index
    %8 = vector.load %arg9[%c0_6, %c0_7] : memref<16x32xf32, #tpu.memory_space<vmem>>, vector<16x32xf32>
    tpu.vector_store %arg9[%c0_6, %c0_7], %7 {strides = array<i32>} : memref<16x32xf32, #tpu.memory_space<vmem>>, vector<16x32xf32>,
    %c0_i32_8 = arith.constant 0 : i32
    %9 = arith.cmpi eq, %arg1, %c0_i32_8 : i32
    %10 = arith.extui %9 : i1 to i32
    %c0_i32_9 = arith.constant 0 : i32
    %11 = arith.cmpi ne, %10, %c0_i32_9 : i32
    scf.if %11 {
      %c0_10 = arith.constant 0 : index
      %c0_11 = arith.constant 0 : index
      %12 = vector.load %arg9[%c0_10, %c0_11] : memref<16x32xf32, #tpu.memory_space<vmem>>, vector<16x32xf32>
      %c0_12 = arith.constant 0 : index
      %c0_13 = arith.constant 0 : index
      %13 = vector.load %arg4[%c0_12, %c0_13] : memref<1x32xf32, #tpu.memory_space<vmem>>, vector<1x32xf32>
      %14 = vector.broadcast %13 : vector<1x32xf32> to vector<16x32xf32>
      %15 = arith.addf %12, %14 : vector<16x32xf32>
      %c0_14 = arith.constant 0 : index
      %c0_15 = arith.constant 0 : index
      %16 = vector.load %arg5[%c0_14, %c0_15] : memref<16x32xbf16, #tpu.memory_space<vmem>>, vector<16x32xbf16>
      %17 = arith.extf %16 : vector<16x32xbf16> to vector<16x32xf32>
      %18 = arith.addf %15, %17 : vector<16x32xf32>
      %cst_16 = arith.constant dense<0.000000e+00> : vector<16xf32>
      %19 = vector.multi_reduction <add>, %18, %cst_16 [1] : vector<16x32xf32> to vector<16xf32>
      %20 = vector.shape_cast %19 : vector<16xf32> to vector<16x1xf32>
      %cst_17 = arith.constant 3.200000e+01 : f32
      %21 = vector.broadcast %cst_17 : f32 to vector<16x1xf32>
      %22 = arith.divf %20, %21 : vector<16x1xf32>
      %23 = vector.broadcast %22 : vector<16x1xf32> to vector<16x32xf32>
      %24 = arith.subf %18, %23 : vector<16x32xf32>
      %25 = arith.mulf %24, %24 : vector<16x32xf32>
      %cst_18 = arith.constant dense<0.000000e+00> : vector<16xf32>
      %26 = vector.multi_reduction <add>, %25, %cst_18 [1] : vector<16x32xf32> to vector<16xf32>
      %27 = vector.shape_cast %26 : vector<16xf32> to vector<16x1xf32>
      %cst_19 = arith.constant 3.200000e+01 : f32
      %28 = vector.broadcast %cst_19 : f32 to vector<16x1xf32>
      %29 = arith.divf %27, %28 : vector<16x1xf32>
      %cst_20 = arith.constant 9.99999996E-13 : f32
      %30 = vector.broadcast %cst_20 : f32 to vector<16x1xf32>
      %31 = arith.addf %29, %30 : vector<16x1xf32>
      %32 = math.rsqrt %31 : vector<16x1xf32>
      %33 = vector.broadcast %32 : vector<16x1xf32> to vector<16x32xf32>
      %34 = arith.mulf %24, %33 : vector<16x32xf32>
      %c0_21 = arith.constant 0 : index
      %c0_22 = arith.constant 0 : index
      %35 = vector.load %arg6[%c0_21, %c0_22] : memref<1x32xf32, #tpu.memory_space<vmem>>, vector<1x32xf32>
      %36 = vector.broadcast %35 : vector<1x32xf32> to vector<16x32xf32>
      %37 = arith.mulf %34, %36 : vector<16x32xf32>
      %c0_23 = arith.constant 0 : index
      %c0_24 = arith.constant 0 : index
      %38 = vector.load %arg7[%c0_23, %c0_24] : memref<1x32xf32, #tpu.memory_space<vmem>>, vector<1x32xf32>
      %39 = vector.broadcast %38 : vector<1x32xf32> to vector<16x32xf32>
      %40 = arith.addf %37, %39 : vector<16x32xf32>
      %41 = arith.truncf %40 : vector<16x32xf32> to vector<16x32xbf16>
      %c0_25 = arith.constant 0 : index
      %c0_26 = arith.constant 0 : index
      %42 = vector.load %arg8[%c0_25, %c0_26] : memref<16x32xbf16, #tpu.memory_space<vmem>>, vector<16x32xbf16>
      tpu.vector_store %arg8[%c0_25, %c0_26], %41 {strides = array<i32>} : memref<16x32xbf16, #tpu.memory_space<vmem>>, vector<16x32xbf16>,
    } else {
    }
    return
  }
  func.func @transform_0(%arg0: i32, %arg1: i32) -> (i32, i32) {
    %c0_i32 = arith.constant 0 : i32
    return %arg0, %arg1 : i32, i32
  }
  func.func @transform_1(%arg0: i32, %arg1: i32) -> (i32, i32) {
    %c0_i32 = arith.constant 0 : i32
    %c0_i32_0 = arith.constant 0 : i32
    return %arg1, %c0_i32 : i32, i32
  }
  func.func @transform_2(%arg0: i32, %arg1: i32) -> (i32, i32) {
    %c0_i32 = arith.constant 0 : i32
    %c0_i32_0 = arith.constant 0 : i32
    %c0_i32_1 = arith.constant 0 : i32
    return %c0_i32, %c0_i32_0 : i32, i32
  }
  func.func @transform_3(%arg0: i32, %arg1: i32) -> (i32, i32) {
    %c0_i32 = arith.constant 0 : i32
    %c0_i32_0 = arith.constant 0 : i32
    return %arg0, %c0_i32 : i32, i32
  }
  func.func @transform_4(%arg0: i32, %arg1: i32) -> (i32, i32) {
    %c0_i32 = arith.constant 0 : i32
    %c0_i32_0 = arith.constant 0 : i32
    %c0_i32_1 = arith.constant 0 : i32
    return %c0_i32, %c0_i32_0 : i32, i32
  }
  func.func @transform_5(%arg0: i32, %arg1: i32) -> (i32, i32) {
    %c0_i32 = arith.constant 0 : i32
    %c0_i32_0 = arith.constant 0 : i32
    %c0_i32_1 = arith.constant 0 : i32
    return %c0_i32, %c0_i32_0 : i32, i32
  }
  func.func @transform_6(%arg0: i32, %arg1: i32) -> (i32, i32) {
    %c0_i32 = arith.constant 0 : i32
    %c0_i32_0 = arith.constant 0 : i32
    return %arg0, %c0_i32 : i32, i32
  }
}

</mosaic_0001>

<bundles_post_ra>
// kernel: two_tower_bert.22
= control target key start
LH: loop header
LB: loop body
LE: loop exit
PB: predicated region body
PF: predicated region fallthrough
CT: control target
= control target key end

     0   :  { %vm18_vm0 = vcmask 261120   ;;  %vm72_vm1 = vcmask 257024   ;;  %s132_s0 = inlined_call_operand.vmem [shape: bf16[16,32], index: 0, kind: input, shape index: {}]   ;;  %s133_s1 = inlined_call_operand.vmem [shape: f32[1,32], index: 1, kind: input, shape index: {}]   ;;  %s134_s2 = inlined_call_operand.vmem [shape: f32[1,32], index: 2, kind: input, shape index: {}]   ;;  %s135_s3 = inlined_call_operand.vmem [shape: bf16[16,32], index: 3, kind: output, shape index: {}]  }
   0x1   :  { %v86_v0 = vld [vmem:[%s132_s0] sm:$0xff]  }
   0x2   :  { %v87_v1 = vunpack.c.l.bf16 %v86_v0  ;;  %v88_v2 = vunpack.c.h.bf16 %v86_v0  ;;  %v79_v22 = vld [vmem:[%s133_s1] ss:$0 sm:$0xff] }
   0x3   :  { %v80_v24 = vld [vmem:[%s134_s2] ss:$0 sm:$0xff] }
   0x4   :  { %v19_v3 = vsel %vm18_vm0, %v87_v1, 0.0  ;;  %v22_v4 = vsel %vm18_vm0, %v88_v2, 0.0 }
   0x5   :  { %20 = vadd.xlane.f32.xlu0 %v19_v3 }
   0x9   :  { %23 = vadd.xlane.f32.xlu0 %v22_v4 }
  0x92   :  { %v21_v5 = vpop.xlane.xlu0 %20 }
  0x93   :  { %v26_v6 = vmul.f32 0.03125, %v21_v5 }
  0x95   :  { %v28_v7 = vsub.f32 %v87_v1, %v26_v6 }
  0x96   :  { %v24_v8 = vpop.xlane.xlu0 %23 }
  0x97   :  { %v27_v9 = vmul.f32 0.03125, %v24_v8  ;;  %v30_v10 = vmul.f32 %v28_v7, %v28_v7 }
  0x99   :  { %v29_v11 = vsub.f32 %v88_v2, %v27_v9  ;;  %v32_v12 = vsel %vm18_vm0, %v30_v10, 0.0 }
  0x9a   :  { %33 = vadd.xlane.f32.xlu1 %v32_v12 }
  0x9b   :  { %v31_v13 = vmul.f32 %v29_v11, %v29_v11 }
  0x9d   :  { %v35_v14 = vsel %vm18_vm0, %v31_v13, 0.0 }
  0x9e   :  { %36 = vadd.xlane.f32.xlu1 %v35_v14 }
 0x127   :  { %v34_v15 = vpop.xlane.xlu1 %33 }
 0x128   :  { %v38_v16 = vmul.f32 0.03125, %v34_v15 }
 0x12a   :  { %v40_v17 = vadd.f32 1e-12, %v38_v16 }
 0x12b   :  { %v37_v18 = vpop.xlane.xlu1 %36 }
 0x12c   :  { %89 = vrsqrt.f32 %v40_v17  ;;  %v39_v19 = vmul.f32 0.03125, %v37_v18 }
 0x12e   :  { %v41_v20 = vadd.f32 1e-12, %v39_v19 }
 0x130   :  { %91 = vrsqrt.f32 %v41_v20 }
 0x136   :  { %v90_v21 = vpop.eup %89 }
 0x137   :  { %v44_v23 = vmul.f32 %v90_v21, %v28_v7 }
 0x139   :  { %v53_v25 = vmul.f32 %v79_v22, %v44_v23 }
 0x13a   :  { %v92_v26 = vpop.eup %91 }
 0x13b   :  { %v62_v27 = vadd.f32 %v80_v24, %v53_v25  ;;  %v45_v28 = vmul.f32 %v92_v26, %v29_v11 }
 0x13d   :  { %v83_v29 = vpack.c.bf16 %v62_v27, %v62_v27  ;;  %v54_v30 = vmul.f32 %v79_v22, %v45_v28 }
 0x13f   :  { %73 = vst.msk [vmem:[%s135_s3] sm:$0xf] %vm72_vm1, %v83_v29  ;;  %v63_v31 = vadd.f32 %v80_v24, %v54_v30 }
 0x141   :  { %v84_v32 = vpack.c.bf16 %v63_v31, %v63_v31 }
 0x143   :  { %74 = vst.msk [vmem:[%s135_s3 + $0x4] sm:$0xf] %vm72_vm1, %v84_v32 }

// kernel: two_tower_bert.23
= control target key start
LH: loop header
LB: loop body
LE: loop exit
PB: predicated region body
PF: predicated region fallthrough
CT: control target
= control target key end

     0   :  { %vm19_vm0 = vcmask 785408   ;;  %v151_v0 = vmov 0.0   ;;  %vm152_vm1 = vmmov 0   ;;  %vm47_vm2 = vcmask 261120   ;;  %s195_s1 = inlined_call_operand.vmem [shape: bf16[32,96], index: 1, kind: input, shape index: {}]   ;;  %s196_s0 = inlined_call_operand.vmem [shape: bf16[16,32], index: 0, kind: input, shape index: {}]   ;;  %s197_s2 = inlined_call_operand.vmem [shape: f32[1,96], index: 2, kind: input, shape index: {}]   ;;  %s198_s3 = inlined_call_operand.vmem [shape: bf16[16,96], index: 3, kind: output, shape index: {}]  }
   0x1   :  { %138 = vmatprep.subr.bf16.mxu0 %v151_v0  ;;  %v148_v1 = vld [vmem:[%s195_s1] sm:$0xff]   ;;  %142 = vmatprep.mubr.msk.bf16.mxu0 %vm152_vm1, %v151_v0  ;;  %20 = vst.msk [vmem:[#allocation2] sm:$0xff] %vm19_vm0, %v151_v0  ;;  %21 = vst.msk [vmem:[#allocation2 + $0x8] sm:$0xff] %vm19_vm0, %v151_v0  ;;  %v149_v2 = vld [vmem:[%s195_s1 + $0x8] sm:$0xff]   ;;  %vm119_vm3 = vcmask 781312  }
   0x2   :  { %139 = vmatpush3.bf16.msra.mxu0 %v148_v1  ;;  %v150_v3 = vld [vmem:[%s196_s0] sm:$0xff]  }
   0x3   :  { %140 = vmatprep.subr.bf16.mxu0 %v151_v0  ;;  %v130_v12 = vld [vmem:[%s197_s2] ss:$0 sm:$0xff] }
   0x6   :  { %141 = vmatpush3.bf16.msra.mxu0 %v149_v2 }
   0x8   :  { %v22_v4 = vld [vmem:[#allocation2] sm:$0xff]  ;;  %v23_v6 = vld [vmem:[#allocation2 + $0x8] sm:$0xff] }
   0x9   :  { %143 = vmatmul.mubr.msk.bf16.vlgmr.msra.gmra.mrb[0].mxu0 %vm47_vm2, %v150_v3 }
  0xdc   :  { %v85_v5 = vpop.f32.mrb[0].mxu0 }
  0xdd   :  { %v92_v7 = vadd.f32 %v85_v5, %v22_v4  ;;  %v144_v8 = vpop.f32.mrb[1].mxu0 }
  0xde   :  { %v88_v9 = vpop.f32.mrb[2].mxu0 }
  0xdf   :  { %95 = vst.msk [vmem:[#allocation2] sm:$0xff] %vm19_vm0, %v92_v7  ;;  %v93_v10 = vadd.f32 %v88_v9, %v23_v6  ;;  %v145_v11 = vpop.f32.mrb[3].mxu0 }
  0xe1   :  { %96 = vst.msk [vmem:[#allocation2 + $0x8] sm:$0xff] %vm19_vm0, %v93_v10 }
  0xe6   :  { %v100_v13 = vld [vmem:[#allocation2] sm:$0xff] }
  0xe7   :  { %v109_v14 = vadd.f32 %v130_v12, %v100_v13 }
  0xe8   :  { %v101_v15 = vld [vmem:[#allocation2 + $0x8] sm:$0xff] }
  0xe9   :  { %v133_v16 = vpack.c.bf16 %v109_v14, %v109_v14  ;;  %v110_v17 = vadd.f32 %v130_v12, %v101_v15 }
  0xeb   :  { %120 = vst.msk [vmem:[%s198_s3] sm:$0xf] %vm119_vm3, %v133_v16  ;;  %v134_v18 = vpack.c.bf16 %v110_v17, %v110_v17 }
  0xed   :  { %121 = vst.msk [vmem:[%s198_s3 + $0x4] sm:$0xf] %vm119_vm3, %v134_v18 }

// kernel: two_tower_bert.24
= control target key start
LH: loop header
LB: loop body
LE: loop exit
PB: predicated region body
PF: predicated region fallthrough
CT: control target
= control target key end

     0   :  { %s810_s15 = smov 0   ;;  %s812_s16 = smov 0   ;;  %s887_s0 = inlined_call_operand.vmem [shape: bf16[2,2,8,16], index: 0, kind: input, shape index: {}]   ;;  %s888_s1 = inlined_call_operand.vmem [shape: bf16[2,2,8,16], index: 1, kind: input, shape index: {}]   ;;  %s889_s2 = inlined_call_operand.vmem [shape: bf16[2,2,8,16], index: 2, kind: input, shape index: {}]   ;;  %s890_s3 = inlined_call_operand.vmem [shape: f32[2,1,8], index: 3, kind: input, shape index: {}]   ;;  %s891_s4 = inlined_call_operand.vmem [shape: bf16[2,2,8,16], index: 4, kind: output, shape index: {}]  }
   0x1   :  { %s814_s17 = smov 0   ;;  %s816_s18 = smov 0  }
   0x2   :  { %s818_s19 = smov 0  }
   0x3 LB: > { %s29_s20 = sadd.s32 1, %s771_s17  ;;  %s33_s21 = sadd.s32 1, %s775_s18  ;;  %s779_s19 = sphi %s818_s19, %s14_s19   ;;  %s775_s18 = sphi %s816_s18, %s895_s18   ;;  %s771_s17 = sphi %s814_s17, %s894_s17   ;;  %s767_s16 = sphi %s812_s16, %s893_s16   ;;  %s763_s15 = sphi %s810_s15, %s892_s15  }
   0x4   : > { %p31_p0 = scmp.ge.s32.totalorder %s29_s20, 2  ;;  %p659_p1 = scmp.ge.s32.totalorder %s779_s19, 1 }
   0x5   : > { %p241_p2 = scmp.lt.s32.totalorder %s779_s19, 5 }
   0x6   : > { %s897_s20 = smov (%p31_p0, %s29_s20), 0  ;;  %s899_s21 = smov (!%p31_p0, %s33_s21), %s775_s18 }
   0x7   : > { %p242_p3 = pnand %p659_p1, %p241_p2  ;;  %p35_p4 = scmp.ge.s32.totalorder %s899_s21, 2 }
   0x8   : > { %p301_p5 = scmp.lt.s32.totalorder (!%p242_p3), %s767_s16, 1  ;;  %p303_p6 = scmp.lt.s32.totalorder (!%p242_p3), %s763_s15, 1  ;;  %vm353_vm0 = vcmask (!%p242_p3), 130048   ;;  %v781_v0 = vmov (!%p242_p3), 0.0   ;;  %vm782_vm1 = vmmov (!%p242_p3), 0   ;;  %vm350_vm2 = vcmask (!%p242_p3), 7168  }
   0x9   : > { %s901_s21 = smov (%p35_p4, %s899_s21), 0  ;;  %245 = sbr.rel (%p242_p3) target bundleno = 831 (0x33f), region = 36 }
   0xa   : > { %677 = vmatprep.subr.bf16.mxu0 (!%p242_p3), %v781_v0  ;;  %354 = vst.msk [vmem:[#allocation4] sm:$0xff] (!%p242_p3), %vm353_vm0, %v781_v0  ;;  %679 = vmatprep.mubr.msk.bf16.mxu0 (!%p242_p3), %vm782_vm1, %v781_v0  ;;  %v783_v4 = vmov (!%p242_p3), -inf   ;;  %vm415_vm3 = vcmask (!%p242_p3), 64512   ;;  %v784_v13 = vmov (!%p242_p3), 0   ;;  %vm450_vm4 = vcmask (!%p242_p3), 1043456  }
   0xb   : > { %683 = vmatprep.subr.bf16.mxu1 (!%p242_p3), %v781_v0  ;;  %685 = vmatprep.mubr.msk.bf16.mxu1 (!%p242_p3), %vm782_vm1, %v781_v0  ;;  %351 = vst.msk [vmem:[#allocation2] sm:$0xff] (!%p242_p3), %vm350_vm2, %v783_v4  ;;  %352 = vst.msk [vmem:[#allocation3] sm:$0xff] (!%p242_p3), %vm350_vm2, %v781_v0  ;;  %vm510_vm5 = vcmask (!%p242_p3), 125952  }
   0xc   : > { %733 = vset.pattern.permute.xlu0 (!%p242_p3), %v784_v13  ;;  %734 = vset.pattern.permute.xlu1 (!%p242_p3), %v784_v13 }
  0x10   : > { %s903_s16 = smov (!%p301_p5, %s767_s16), 1  ;;  %s905_s15 = smov (!%p303_p6, %s763_s15), 1 }
  0x11   : > { %s660_s22 = sshll.u32 %s903_s16, 1  ;;  %s336_s7 = scalar_lea.vmem %s890_s3, %s903_s16  ;;  %v439_v33 = vld [vmem:[#allocation4] sm:$0xff] }
  0x12   : > { %s306_s23 = sadd.s32 %s660_s22, %s905_s15  ;;  %v669_v6 = vld [vmem:[%s336_s7] ss:$0 sm:$0xff]  ;;  %v431_v28 = vld [vmem:[#allocation3] sm:$0xff] }
  0x13   : > { %s841_s24 = sshll.u32 %s306_s23, 2  ;;  %v414_v14 = vld [vmem:[#allocation2] sm:$0xff] }
  0x14   : > { %s319_s27 = scalar_lea.vmem %s888_s1, %s841_s24  ;;  %s308_s30 = scalar_lea.vmem %s887_s0, %s841_s24 }
  0x15   : > { %v356_v1 = vld [vmem:[%s319_s27] sm:$0xf]  ;;  %s330_s10 = scalar_lea.vmem %s889_s2, %s841_s24  ;;  %s344_s13 = scalar_lea.vmem %s891_s4, %s841_s24 }
  0x16   : > { %v364_v2 = vsel %vm353_vm0, %v356_v1, 0  ;;  %v355_v3 = vld [vmem:[%s308_s30] sm:$0xf] }
  0x17   : > { %678 = vmatpush3.bf16.xpose.msra.mxu0 %v364_v2  ;;  %v357_v18 = vld [vmem:[%s330_s10] sm:$0xf] }
  0x18   : > { %v452_v19 = vsel %vm450_vm4, %v357_v18, 0 }
  0x19   : > { %684 = vmatpush3.bf16.msra.mxu1 %v452_v19 }
  0x1e   : > { %680 = vmatmul.mubr.msk.bf16.vlgmr.msra.gmra.mrb[0].mxu0 %vm353_vm0, %v355_v3 }
  0xf1   : > { %v400_v5 = vpop.f32.mrb[0].mxu0 }
  0xf2   : > { %v406_v7 = vmul.f32 0.25, %v400_v5  ;;  %v681_v8 = vpop.f32.mrb[1].mxu0 }
  0xf3   : > { %v403_v9 = vpop.f32.mrb[2].mxu0 }
  0xf4   : > { %v682_v10 = vpop.f32.mrb[3].mxu0  ;;  %v413_v11 = vadd.f32 %v669_v6, %v406_v7 }
  0xf6   : > { %v416_v12 = vsel %vm415_vm3, %v413_v11, -inf }
  0xf7   : > { %417 = vmax.xlane.f32.xlu0 %v416_v12 }
 0x184   : > { %v418_v15 = vpop.xlane.xlu0 %417 }
 0x185   : > { %v419_v16 = vmax.f32 %v414_v14, %v418_v15 }
 0x187   : > { %v420_v17 = vsub.f32 %v414_v14, %v419_v16  ;;  %496 = vst.msk [vmem:[#allocation2] sm:$0xff] %vm350_vm2, %v419_v16  ;;  %425 = vperm.xlu0 %733, %v419_v16  }
 0x189   : > { %v421_v26 = vmul.f32 1.442695, %v420_v17 }
 0x206   : > { %v426_v20 = vpop.permute.xlu0 %425 }
 0x207   : > { %v428_v21 = vsub.f32 %v413_v11, %v426_v20 }
 0x209   : > { %v429_v22 = vmul.f32 1.442695, %v428_v21 }
 0x20b   : > { %735 = vpow2.f32 %v429_v22 }
 0x20c   : > { %737 = vpow2.f32 %v421_v26 }
 0x215   : > { %v736_v23 = vpop.eup %735 }
 0x216   : > { %v433_v24 = vsel %vm415_vm3, %v736_v23, 0.0  ;;  %v446_v25 = vpack.c.bf16 %v736_v23, %v736_v23  ;;  %v738_v27 = vpop.eup %737 }
 0x217   : > { %434 = vadd.xlane.f32.xlu1 %v433_v24  ;;  %v432_v29 = vmul.f32 %v738_v27, %v431_v28 }
 0x218   : > { %686 = vmatmul.mubr.msk.bf16.vlgmr.msra.gmra.mrb[0].mxu1 %vm415_vm3, %v446_v25 }
 0x228   : > { %442 = vperm.xlu1 %734, %v738_v27  }
 0x2a4   : > { %v435_v30 = vpop.xlane.xlu1 %434 }
 0x2a5   : > { %v436_v31 = vadd.f32 %v435_v30, %v432_v29 }
 0x2a7   : > { %438 = vst.msk [vmem:[#allocation3] sm:$0xff] %vm350_vm2, %v436_v31 }
 0x2a8   : > { %v443_v34 = vpop.permute.xlu1 %442 }
 0x2a9   : > { %v445_v35 = vmul.f32 %v443_v34, %v439_v33 }
 0x2ae   : > { %v501_v32 = vld [vmem:[#allocation3] sm:$0xff] }
 0x2af   : > { %504 = vperm.xlu1 %734, %v501_v32  }
 0x2eb   : > { %v488_v36 = vpop.f32.mrb[0].mxu1 }
 0x2ec   : > { %v494_v37 = vadd.f32 %v488_v36, %v445_v35  ;;  %v687_v38 = vpop.f32.mrb[1].mxu1 }
 0x2ed   : > { %v491_v39 = vpop.f32.mrb[2].mxu1 }
 0x2ee   : > { %495 = vst.msk [vmem:[#allocation4] sm:$0xff] %vm353_vm0, %v494_v37  ;;  %v688_v40 = vpop.f32.mrb[3].mxu1 }
 0x2f5   : > { %v500_v43 = vld [vmem:[#allocation4] sm:$0xff] }
 0x32e   : > { %v505_v41 = vpop.permute.xlu1 %504 }
 0x32f   : > { %739 = vrcp.f32 %v505_v41 }
 0x339   : > { %v740_v42 = vpop.eup %739 }
 0x33a   : > { %v508_v44 = vmul.f32 %v740_v42, %v500_v43 }
 0x33c   : > { %v509_v45 = vpack.c.bf16 %v508_v44, %v508_v44 }
 0x33e   : > { %511 = vst.msk [vmem:[%s344_s13] sm:$0xf] %vm510_vm5, %v509_v45 }
 0x33f PF: > { %s14_s19 = sadd.s32 1, %s779_s19   ;;  %s892_s15 = smov %s771_s17 }
 0x340   : > { %p11_p7 = scmp.ge.s32.totalorder %s14_s19, 6   ;;  %s893_s16 = smov %s775_s18 }
 0x341   : > { %s894_s17 = smov %s897_s20  ;;  %s895_s18 = smov %s901_s21 }
 0x342   :  { %13 = sbr.rel (!%p11_p7) target bundleno = 3 (0x3), region = 83 }

// kernel: two_tower_bert.25
= control target key start
LH: loop header
LB: loop body
LE: loop exit
PB: predicated region body
PF: predicated region fallthrough
CT: control target
= control target key end

     0   :  { %vm28_vm0 = vcmask 261120   ;;  %v220_v0 = vmov 0.0   ;;  %vm221_vm1 = vmmov 0   ;;  %vm178_vm2 = vcmask 257024   ;;  %s293_s1 = inlined_call_operand.vmem [shape: bf16[32,32], index: 1, kind: input, shape index: {}]   ;;  %s294_s0 = inlined_call_operand.vmem [shape: bf16[16,32], index: 0, kind: input, shape index: {}]   ;;  %s295_s3 = inlined_call_operand.vmem [shape: bf16[16,32], index: 3, kind: input, shape index: {}]   ;;  %s296_s2 = inlined_call_operand.vmem [shape: f32[1,32], index: 2, kind: input, shape index: {}]   ;;  %s297_s4 = inlined_call_operand.vmem [shape: f32[1,32], index: 4, kind: input, shape index: {}]   ;;  %s298_s5 = inlined_call_operand.vmem [shape: f32[1,32], index: 5, kind: input, shape index: {}]   ;;  %s299_s6 = inlined_call_operand.vmem [shape: bf16[16,32], index: 6, kind: output, shape index: {}]  }
   0x1   :  { %203 = vmatprep.subr.bf16.mxu0 %v220_v0  ;;  %v213_v1 = vld [vmem:[%s293_s1] sm:$0xff]   ;;  %207 = vmatprep.mubr.msk.bf16.mxu0 %vm221_vm1, %v220_v0  ;;  %29 = vst.msk [vmem:[#allocation2] sm:$0xff] %vm28_vm0, %v220_v0  ;;  %30 = vst.msk [vmem:[#allocation2 + $0x8] sm:$0xff] %vm28_vm0, %v220_v0  ;;  %v214_v2 = vld [vmem:[%s293_s1 + $0x8] sm:$0xff]  }
   0x2   :  { %204 = vmatpush3.bf16.msra.mxu0 %v213_v1  ;;  %v215_v3 = vld [vmem:[%s294_s0] sm:$0xff]  }
   0x3   :  { %205 = vmatprep.subr.bf16.mxu0 %v220_v0  ;;  %v197_v12 = vld [vmem:[%s295_s3] sm:$0xff]  }
   0x4   :  { %v189_v13 = vld [vmem:[%s296_s2] ss:$0 sm:$0xff]  ;;  %v198_v14 = vunpack.c.l.bf16 %v197_v12  ;;  %v199_v17 = vunpack.c.h.bf16 %v197_v12 }
   0x5   :  { %v190_v41 = vld [vmem:[%s297_s4] ss:$0 sm:$0xff] }
   0x6   :  { %206 = vmatpush3.bf16.msra.mxu0 %v214_v2  ;;  %v191_v43 = vld [vmem:[%s298_s5] ss:$0 sm:$0xff] }
   0x8   :  { %v31_v4 = vld [vmem:[#allocation2] sm:$0xff]  ;;  %v32_v6 = vld [vmem:[#allocation2 + $0x8] sm:$0xff] }
   0x9   :  { %208 = vmatmul.mubr.msk.bf16.vlgmr.msra.gmra.mrb[0].mxu0 %vm28_vm0, %v215_v3 }
  0xdc   :  { %v94_v5 = vpop.f32.mrb[0].mxu0 }
  0xdd   :  { %v101_v7 = vadd.f32 %v94_v5, %v31_v4  ;;  %v209_v8 = vpop.f32.mrb[1].mxu0 }
  0xde   :  { %v97_v9 = vpop.f32.mrb[2].mxu0 }
  0xdf   :  { %103 = vst.msk [vmem:[#allocation2] sm:$0xff] %vm28_vm0, %v101_v7  ;;  %v102_v10 = vadd.f32 %v97_v9, %v32_v6  ;;  %v210_v11 = vpop.f32.mrb[3].mxu0 }
  0xe1   :  { %104 = vst.msk [vmem:[#allocation2 + $0x8] sm:$0xff] %vm28_vm0, %v102_v10 }
  0xe6   :  { %v108_v15 = vld [vmem:[#allocation2] sm:$0xff] }
  0xe7   :  { %v117_v16 = vadd.f32 %v189_v13, %v108_v15 }
  0xe8   :  { %v109_v18 = vld [vmem:[#allocation2 + $0x8] sm:$0xff] }
  0xe9   :  { %v123_v19 = vadd.f32 %v198_v14, %v117_v16  ;;  %v118_v20 = vadd.f32 %v189_v13, %v109_v18 }
  0xeb   :  { %v125_v21 = vsel %vm28_vm0, %v123_v19, 0.0  ;;  %v124_v22 = vadd.f32 %v199_v17, %v118_v20 }
  0xec   :  { %126 = vadd.xlane.f32.xlu0 %v125_v21 }
  0xed   :  { %v128_v23 = vsel %vm28_vm0, %v124_v22, 0.0 }
  0xf0   :  { %129 = vadd.xlane.f32.xlu0 %v128_v23 }
 0x179   :  { %v127_v24 = vpop.xlane.xlu0 %126 }
 0x17a   :  { %v132_v25 = vmul.f32 0.03125, %v127_v24 }
 0x17c   :  { %v134_v26 = vsub.f32 %v123_v19, %v132_v25 }
 0x17d   :  { %v130_v27 = vpop.xlane.xlu0 %129 }
 0x17e   :  { %v133_v28 = vmul.f32 0.03125, %v130_v27  ;;  %v136_v29 = vmul.f32 %v134_v26, %v134_v26 }
 0x180   :  { %v135_v30 = vsub.f32 %v124_v22, %v133_v28  ;;  %v138_v31 = vsel %vm28_vm0, %v136_v29, 0.0 }
 0x181   :  { %139 = vadd.xlane.f32.xlu1 %v138_v31 }
 0x182   :  { %v137_v32 = vmul.f32 %v135_v30, %v135_v30 }
 0x184   :  { %v141_v33 = vsel %vm28_vm0, %v137_v32, 0.0 }
 0x185   :  { %142 = vadd.xlane.f32.xlu1 %v141_v33 }
 0x20e   :  { %v140_v34 = vpop.xlane.xlu1 %139 }
 0x20f   :  { %v144_v35 = vmul.f32 0.03125, %v140_v34 }
 0x211   :  { %v146_v36 = vadd.f32 1e-12, %v144_v35 }
 0x212   :  { %v143_v37 = vpop.xlane.xlu1 %142 }
 0x213   :  { %216 = vrsqrt.f32 %v146_v36  ;;  %v145_v38 = vmul.f32 0.03125, %v143_v37 }
 0x215   :  { %v147_v39 = vadd.f32 1e-12, %v145_v38 }
 0x217   :  { %218 = vrsqrt.f32 %v147_v39 }
 0x21d   :  { %v217_v40 = vpop.eup %216 }
 0x21e   :  { %v150_v42 = vmul.f32 %v217_v40, %v134_v26 }
 0x220   :  { %v159_v44 = vmul.f32 %v190_v41, %v150_v42 }
 0x221   :  { %v219_v45 = vpop.eup %218 }
 0x222   :  { %v168_v46 = vadd.f32 %v191_v43, %v159_v44  ;;  %v151_v47 = vmul.f32 %v219_v45, %v135_v30 }
 0x224   :  { %v194_v48 = vpack.c.bf16 %v168_v46, %v168_v46  ;;  %v160_v49 = vmul.f32 %v190_v41, %v151_v47 }
 0x226   :  { %179 = vst.msk [vmem:[%s299_s6] sm:$0xf] %vm178_vm2, %v194_v48  ;;  %v169_v50 = vadd.f32 %v191_v43, %v160_v49 }
 0x228   :  { %v195_v51 = vpack.c.bf16 %v169_v50, %v169_v50 }
 0x22a   :  { %180 = vst.msk [vmem:[%s299_s6 + $0x4] sm:$0xf] %vm178_vm2, %v195_v51 }

// kernel: two_tower_bert.26
= control target key start
LH: loop header
LB: loop body
LE: loop exit
PB: predicated region body
PF: predicated region fallthrough
CT: control target
= control target key end

     0   :  { %vm19_vm0 = vcmask 523264   ;;  %v173_v0 = vmov 0.0   ;;  %vm174_vm1 = vmmov 0   ;;  %vm47_vm2 = vcmask 261120   ;;  %s217_s1 = inlined_call_operand.vmem [shape: bf16[32,64], index: 1, kind: input, shape index: {}]   ;;  %s218_s0 = inlined_call_operand.vmem [shape: bf16[16,32], index: 0, kind: input, shape index: {}]   ;;  %s219_s2 = inlined_call_operand.vmem [shape: f32[1,64], index: 2, kind: input, shape index: {}]   ;;  %s220_s3 = inlined_call_operand.vmem [shape: bf16[16,64], index: 3, kind: output, shape index: {}]  }
   0x1   :  { %156 = vmatprep.subr.bf16.mxu0 %v173_v0  ;;  %v166_v1 = vld [vmem:[%s217_s1] sm:$0xff]   ;;  %160 = vmatprep.mubr.msk.bf16.mxu0 %vm174_vm1, %v173_v0  ;;  %20 = vst.msk [vmem:[#allocation2] sm:$0xff] %vm19_vm0, %v173_v0  ;;  %21 = vst.msk [vmem:[#allocation2 + $0x8] sm:$0xff] %vm19_vm0, %v173_v0  ;;  %v167_v2 = vld [vmem:[%s217_s1 + $0x8] sm:$0xff]   ;;  %vm137_vm3 = vcmask 519168  }
   0x2   :  { %157 = vmatpush3.bf16.msra.mxu0 %v166_v1  ;;  %v168_v3 = vld [vmem:[%s218_s0] sm:$0xff]  }
   0x3   :  { %158 = vmatprep.subr.bf16.mxu0 %v173_v0  ;;  %v148_v12 = vld [vmem:[%s219_s2] ss:$0 sm:$0xff] }
   0x6   :  { %159 = vmatpush3.bf16.msra.mxu0 %v167_v2 }
   0x8   :  { %v22_v4 = vld [vmem:[#allocation2] sm:$0xff]  ;;  %v23_v6 = vld [vmem:[#allocation2 + $0x8] sm:$0xff] }
   0x9   :  { %161 = vmatmul.mubr.msk.bf16.vlgmr.msra.gmra.mrb[0].mxu0 %vm47_vm2, %v168_v3 }
  0xdc   :  { %v85_v5 = vpop.f32.mrb[0].mxu0 }
  0xdd   :  { %v92_v7 = vadd.f32 %v85_v5, %v22_v4  ;;  %v162_v8 = vpop.f32.mrb[1].mxu0 }
  0xde   :  { %v88_v9 = vpop.f32.mrb[2].mxu0 }
  0xdf   :  { %95 = vst.msk [vmem:[#allocation2] sm:$0xff] %vm19_vm0, %v92_v7  ;;  %v93_v10 = vadd.f32 %v88_v9, %v23_v6  ;;  %v163_v11 = vpop.f32.mrb[3].mxu0 }
  0xe1   :  { %96 = vst.msk [vmem:[#allocation2 + $0x8] sm:$0xff] %vm19_vm0, %v93_v10 }
  0xe6   :  { %v100_v13 = vld [vmem:[#allocation2] sm:$0xff] }
  0xe7   :  { %v109_v14 = vadd.f32 %v148_v12, %v100_v13 }
  0xe8   :  { %v101_v15 = vld [vmem:[#allocation2 + $0x8] sm:$0xff] }
  0xe9   :  { %v113_v16 = vmul.f32 0.044715, %v109_v14  ;;  %v110_v17 = vadd.f32 %v148_v12, %v101_v15  ;;  %v111_v28 = vmul.f32 0.5, %v109_v14 }
  0xeb   :  { %v115_v18 = vmul.f32 %v113_v16, %v109_v14  ;;  %v114_v19 = vmul.f32 0.044715, %v110_v17  ;;  %v112_v32 = vmul.f32 0.5, %v110_v17 }
  0xed   :  { %v117_v20 = vmul.f32 %v115_v18, %v109_v14  ;;  %v116_v21 = vmul.f32 %v114_v19, %v110_v17 }
  0xef   :  { %v119_v22 = vadd.f32 %v117_v20, %v109_v14  ;;  %v118_v23 = vmul.f32 %v116_v21, %v110_v17 }
  0xf1   :  { %v121_v24 = vmul.f32 0.7978846, %v119_v22  ;;  %v120_v25 = vadd.f32 %v118_v23, %v110_v17 }
  0xf3   :  { %169 = vtanh.f32 %v121_v24  ;;  %v122_v26 = vmul.f32 0.7978846, %v120_v25 }
  0xf5   :  { %171 = vtanh.f32 %v122_v26 }
  0xfd   :  { %v170_v27 = vpop.eup %169 }
  0xfe   :  { %v125_v29 = vadd.f32 1.0, %v170_v27 }
  0xff   :  { %v172_v30 = vpop.eup %171 }
 0x100   :  { %v127_v31 = vmul.f32 %v125_v29, %v111_v28  ;;  %v126_v33 = vadd.f32 1.0, %v172_v30 }
 0x102   :  { %v151_v34 = vpack.c.bf16 %v127_v31, %v127_v31  ;;  %v128_v35 = vmul.f32 %v126_v33, %v112_v32 }
 0x104   :  { %138 = vst.msk [vmem:[%s220_s3] sm:$0xf] %vm137_vm3, %v151_v34  ;;  %v152_v36 = vpack.c.bf16 %v128_v35, %v128_v35 }
 0x106   :  { %139 = vst.msk [vmem:[%s220_s3 + $0x4] sm:$0xf] %vm137_vm3, %v152_v36 }

// kernel: two_tower_bert.27
= control target key start
LH: loop header
LB: loop body
LE: loop exit
PB: predicated region body
PF: predicated region fallthrough
CT: control target
= control target key end

     0   :  { %vm28_vm0 = vcmask 261120   ;;  %v247_v0 = vmov 0.0   ;;  %vm248_vm1 = vmmov 0   ;;  %vm72_vm2 = vcmask 523264   ;;  %s325_s1 = inlined_call_operand.vmem [shape: bf16[64,32], index: 1, kind: input, shape index: {}]   ;;  %s326_s0 = inlined_call_operand.vmem [shape: bf16[16,64], index: 0, kind: input, shape index: {}]   ;;  %s327_s3 = inlined_call_operand.vmem [shape: bf16[16,32], index: 3, kind: input, shape index: {}]   ;;  %s328_s2 = inlined_call_operand.vmem [shape: f32[1,32], index: 2, kind: input, shape index: {}]   ;;  %s329_s4 = inlined_call_operand.vmem [shape: f32[1,32], index: 4, kind: input, shape index: {}]   ;;  %s330_s5 = inlined_call_operand.vmem [shape: f32[1,32], index: 5, kind: input, shape index: {}]   ;;  %s331_s6 = inlined_call_operand.vmem [shape: bf16[16,32], index: 6, kind: output, shape index: {}]  }
   0x1   :  { %224 = vmatprep.subr.bf16.mxu0 %v247_v0  ;;  %v238_v1 = vld [vmem:[%s325_s1] sm:$0xff]   ;;  %232 = vmatprep.mubr.msk.bf16.mxu0 %vm248_vm1, %v247_v0  ;;  %29 = vst.msk [vmem:[#allocation2] sm:$0xff] %vm28_vm0, %v247_v0  ;;  %30 = vst.msk [vmem:[#allocation2 + $0x8] sm:$0xff] %vm28_vm0, %v247_v0  ;;  %v239_v2 = vld [vmem:[%s325_s1 + $0x8] sm:$0xff]   ;;  %vm195_vm3 = vcmask 257024  }
   0x2   :  { %225 = vmatpush3.bf16.msra.mxu0 %v238_v1  ;;  %v240_v3 = vld [vmem:[%s325_s1 + $0x10] sm:$0xff]   ;;  %v241_v4 = vld [vmem:[%s325_s1 + $0x18] sm:$0xff]   ;;  %v242_v5 = vld [vmem:[%s326_s0] sm:$0xff]  }
   0x3   :  { %226 = vmatprep.subr.bf16.mxu0 %v247_v0  ;;  %v216_v14 = vld [vmem:[%s327_s3] sm:$0xff]  }
   0x4   :  { %v208_v15 = vld [vmem:[%s328_s2] ss:$0 sm:$0xff]  ;;  %v217_v16 = vunpack.c.l.bf16 %v216_v14  ;;  %v218_v19 = vunpack.c.h.bf16 %v216_v14 }
   0x5   :  { %v209_v43 = vld [vmem:[%s329_s4] ss:$0 sm:$0xff] }
   0x6   :  { %227 = vmatpush3.bf16.msra.mxu0 %v239_v2  ;;  %v210_v45 = vld [vmem:[%s330_s5] ss:$0 sm:$0xff] }
   0x7   :  { %228 = vmatprep.subr.bf16.mxu0 %v247_v0 }
   0x8   :  { %v31_v6 = vld [vmem:[#allocation2] sm:$0xff]  ;;  %v32_v8 = vld [vmem:[#allocation2 + $0x8] sm:$0xff] }
   0xa   :  { %229 = vmatpush3.bf16.msra.mxu0 %v240_v3 }
   0xb   :  { %230 = vmatprep.subr.bf16.mxu0 %v247_v0 }
   0xe   :  { %231 = vmatpush3.bf16.msra.mxu0 %v241_v4 }
  0x11   :  { %233 = vmatmul.mubr.msk.bf16.vlgmr.msra.gmra.mrb[0].mxu0 %vm72_vm2, %v242_v5 }
  0xe4   :  { %v110_v7 = vpop.f32.mrb[0].mxu0 }
  0xe5   :  { %v117_v9 = vadd.f32 %v110_v7, %v31_v6  ;;  %v234_v10 = vpop.f32.mrb[1].mxu0 }
  0xe6   :  { %v113_v11 = vpop.f32.mrb[2].mxu0 }
  0xe7   :  { %120 = vst.msk [vmem:[#allocation2] sm:$0xff] %vm28_vm0, %v117_v9  ;;  %v118_v12 = vadd.f32 %v113_v11, %v32_v8  ;;  %v235_v13 = vpop.f32.mrb[3].mxu0 }
  0xe9   :  { %121 = vst.msk [vmem:[#allocation2 + $0x8] sm:$0xff] %vm28_vm0, %v118_v12 }
  0xee   :  { %v125_v17 = vld [vmem:[#allocation2] sm:$0xff] }
  0xef   :  { %v134_v18 = vadd.f32 %v208_v15, %v125_v17 }
  0xf0   :  { %v126_v20 = vld [vmem:[#allocation2 + $0x8] sm:$0xff] }
  0xf1   :  { %v140_v21 = vadd.f32 %v217_v16, %v134_v18  ;;  %v135_v22 = vadd.f32 %v208_v15, %v126_v20 }
  0xf3   :  { %v142_v23 = vsel %vm28_vm0, %v140_v21, 0.0  ;;  %v141_v24 = vadd.f32 %v218_v19, %v135_v22 }
  0xf4   :  { %143 = vadd.xlane.f32.xlu0 %v142_v23 }
  0xf5   :  { %v145_v25 = vsel %vm28_vm0, %v141_v24, 0.0 }
  0xf8   :  { %146 = vadd.xlane.f32.xlu0 %v145_v25 }
 0x181   :  { %v144_v26 = vpop.xlane.xlu0 %143 }
 0x182   :  { %v149_v27 = vmul.f32 0.03125, %v144_v26 }
 0x184   :  { %v151_v28 = vsub.f32 %v140_v21, %v149_v27 }
 0x185   :  { %v147_v29 = vpop.xlane.xlu0 %146 }
 0x186   :  { %v150_v30 = vmul.f32 0.03125, %v147_v29  ;;  %v153_v31 = vmul.f32 %v151_v28, %v151_v28 }
 0x188   :  { %v152_v32 = vsub.f32 %v141_v24, %v150_v30  ;;  %v155_v33 = vsel %vm28_vm0, %v153_v31, 0.0 }
 0x189   :  { %156 = vadd.xlane.f32.xlu1 %v155_v33 }
 0x18a   :  { %v154_v34 = vmul.f32 %v152_v32, %v152_v32 }
 0x18c   :  { %v158_v35 = vsel %vm28_vm0, %v154_v34, 0.0 }
 0x18d   :  { %159 = vadd.xlane.f32.xlu1 %v158_v35 }
 0x216   :  { %v157_v36 = vpop.xlane.xlu1 %156 }
 0x217   :  { %v161_v37 = vmul.f32 0.03125, %v157_v36 }
 0x219   :  { %v163_v38 = vadd.f32 1e-12, %v161_v37 }
 0x21a   :  { %v160_v39 = vpop.xlane.xlu1 %159 }
 0x21b   :  { %243 = vrsqrt.f32 %v163_v38  ;;  %v162_v40 = vmul.f32 0.03125, %v160_v39 }
 0x21d   :  { %v164_v41 = vadd.f32 1e-12, %v162_v40 }
 0x21f   :  { %245 = vrsqrt.f32 %v164_v41 }
 0x225   :  { %v244_v42 = vpop.eup %243 }
 0x226   :  { %v167_v44 = vmul.f32 %v244_v42, %v151_v28 }
 0x228   :  { %v176_v46 = vmul.f32 %v209_v43, %v167_v44 }
 0x229   :  { %v246_v47 = vpop.eup %245 }
 0x22a   :  { %v185_v48 = vadd.f32 %v210_v45, %v176_v46  ;;  %v168_v49 = vmul.f32 %v246_v47, %v152_v32 }
 0x22c   :  { %v213_v50 = vpack.c.bf16 %v185_v48, %v185_v48  ;;  %v177_v51 = vmul.f32 %v209_v43, %v168_v49 }
 0x22e   :  { %196 = vst.msk [vmem:[%s331_s6] sm:$0xf] %vm195_vm3, %v213_v50  ;;  %v186_v52 = vadd.f32 %v210_v45, %v177_v51 }
 0x230   :  { %v214_v53 = vpack.c.bf16 %v186_v52, %v186_v52 }
 0x232   :  { %197 = vst.msk [vmem:[%s331_s6 + $0x4] sm:$0xf] %vm195_vm3, %v214_v53 }

</bundles_post_ra>
